<compile_context>
chip_gen: v7x
topology: tpu7x:2x2x1
jax: 0.10.0
libtpu: 0.0.40
codegen_flags: <defaults>
</compile_context>

<pallas_src>
import math

import jax
import jax.numpy as jnp
import numpy as np
from jax.experimental import pallas as pl
from jax.experimental.pallas import tpu as pltpu  # noqa: F401  (TPU backend assumed)

D_MODEL = 32
NHEAD = 4
NUM_LAYERS = 2
HEAD_DIM = D_MODEL // NHEAD
LN_EPS = 1e-5
N_PARAMS_PER_LAYER = 12


def _layernorm(x, gamma, beta):
    mu = jnp.mean(x, axis=-1, keepdims=True)
    xc = x - mu
    var = jnp.mean(xc * xc, axis=-1, keepdims=True)
    inv = jax.lax.rsqrt(var + LN_EPS)
    return xc * inv * gamma + beta


def encoder_kernel(x_ref, *refs):
    """Fused forward over all layers and the whole batch.

    refs = (layer0 params..., layer1 params..., ..., o_ref)
    Per-layer param order:
      ln1_g, ln1_b, wqkv, bqkv, wo, bo, ln2_g, ln2_b, w1, b1, w2, b2
    (wqkv / bqkv already have 1/sqrt(head_dim) folded into the Q columns.)
    """
    o_ref = refs[-1]
    wrefs = refs[:-1]
    num_layers = len(wrefs) // N_PARAMS_PER_LAYER

    B, S, D = x_ref.shape
    dh = D // NHEAD

    x = x_ref[...].reshape(B * S, D)            # activations live in VMEM/vregs

    for layer in range(num_layers):             # static unroll over layers
        base = layer * N_PARAMS_PER_LAYER
        (ln1_g, ln1_b, wqkv, bqkv, wo, bo,
         ln2_g, ln2_b, w1, b1, w2, b2) = [wrefs[base + i][...]
                                          for i in range(N_PARAMS_PER_LAYER)]

        # ---- self-attention branch: x + Attn(LN1(x), LN1(x), LN1(x)) ----
        xn = _layernorm(x, ln1_g, ln1_b)
        qkv = jnp.dot(xn, wqkv, preferred_element_type=jnp.float32) + bqkv  # (B*S, 3D)

        def split_heads(col0):
            # (B*S, D) column block -> (NHEAD*B, S, dh) batched over (head, batch)
            return jnp.concatenate(
                [qkv[:, col0 + h * dh: col0 + (h + 1) * dh].reshape(B, S, dh)
                 for h in range(NHEAD)], axis=0)

        qh = split_heads(0)          # scale already folded into the weights
        kh = split_heads(D)
        vh = split_heads(2 * D)

        s = jnp.einsum('nqd,nkd->nqk', qh, kh,
                       preferred_element_type=jnp.float32)          # (H*B, S, S)
        s = s - jnp.max(s, axis=-1, keepdims=True)
        p = jnp.exp(s)
        p = p * pl.reciprocal(jnp.sum(p, axis=-1, keepdims=True), approx=True)
        oh = jnp.einsum('nqk,nkd->nqd', p, vh,
                        preferred_element_type=jnp.float32)         # (H*B, S, dh)

        # concat heads back to (B*S, D), single output-projection matmul
        attn = jnp.concatenate(
            [oh[h * B:(h + 1) * B].reshape(B * S, dh) for h in range(NHEAD)],
            axis=-1)
        attn = jnp.dot(attn, wo, preferred_element_type=jnp.float32) + bo
        x = x + attn                                                  # residual 1

        # ---- feed-forward branch: x + FF(LN2(x)) ----
        xn2 = _layernorm(x, ln2_g, ln2_b)
        h1 = jnp.maximum(
            jnp.dot(xn2, w1, preferred_element_type=jnp.float32) + b1, 0.0)
        ff = jnp.dot(h1, w2, preferred_element_type=jnp.float32) + b2
        x = x + ff                                                    # residual 2

    o_ref[...] = x.reshape(B, S, D)


def _pack_layer_params(p):
    """Pre-fold the softmax scale into Q and fuse the QKV projection weights."""
    scale = 1.0 / math.sqrt(HEAD_DIM)
    wqkv = jnp.concatenate([p["wq"] * scale, p["wk"], p["wv"]], axis=1)  # (D, 3D)
    bqkv = jnp.concatenate([p["bq"] * scale, p["bk"], p["bv"]], axis=1)  # (1, 3D)
    return [p["ln1_g"], p["ln1_b"], wqkv, bqkv, p["wo"], p["bo"],
            p["ln2_g"], p["ln2_b"], p["w1"], p["b1"], p["w2"], p["b2"]]


@jax.jit
def sets_transformer_encoder(x, x_coords, all_params):
    # x_coords is accepted but unused, matching the PyTorch forward.
    del x_coords
    B, S, D = x.shape
    flat = []
    for p in all_params:
        flat.extend(_pack_layer_params(p))
    # No grid: one kernel invocation, whole (B,S,D) activation block and all
    # layer weights (< 100 KiB total) resident in VMEM.
    return pl.pallas_call(
        encoder_kernel,
        out_shape=jax.ShapeDtypeStruct((B, S, D), x.dtype),
    )(x, *flat)


# ---------------- deterministic parameter init ----------------
def init_layer_params(key, d_model):
    ks = jax.random.split(key, 8)
    D = d_model

    def rnd(k, shape, scale=0.05):
        return (scale * jax.random.normal(k, shape)).astype(jnp.float32)

    # PyTorch layouts, then pre-transpose for "x @ W" inside the kernel.
    in_proj_w = rnd(ks[0], (3 * D, D))      # rows: [Wq; Wk; Wv]
    in_proj_b = rnd(ks[1], (3 * D,))
    out_proj_w = rnd(ks[2], (D, D))
    out_proj_b = rnd(ks[3], (D,))
    w1 = rnd(ks[4], (D, D))
    b1 = rnd(ks[5], (D,))
    w2 = rnd(ks[6], (D, D))
    b2 = rnd(ks[7], (D,))

    row = lambda v: v.reshape(1, -1).astype(jnp.float32)
    return {
        "ln1_g": jnp.ones((1, D), jnp.float32),
        "ln1_b": jnp.zeros((1, D), jnp.float32),
        "wq": in_proj_w[:D].T,
        "wk": in_proj_w[D:2 * D].T,
        "wv": in_proj_w[2 * D:].T,
        "bq": row(in_proj_b[:D]),
        "bk": row(in_proj_b[D:2 * D]),
        "bv": row(in_proj_b[2 * D:]),
        "wo": out_proj_w.T,
        "bo": row(out_proj_b),
        "ln2_g": jnp.ones((1, D), jnp.float32),
        "ln2_b": jnp.zeros((1, D), jnp.float32),
        "w1": w1.T,
        "b1": row(b1),
        "w2": w2.T,
        "b2": row(b2),
    }


# ---------------- pure-JAX reference for correctness ----------------
def layer_ref(x, p):
    def ln(z, g, b):
        mu = z.mean(-1, keepdims=True)
        var = ((z - mu) ** 2).mean(-1, keepdims=True)
        return (z - mu) / jnp.sqrt(var + LN_EPS) * g + b

    B, S, D = x.shape
    xn = ln(x, p["ln1_g"], p["ln1_b"])
    q = xn @ p["wq"] + p["bq"]
    k = xn @ p["wk"] + p["bk"]
    v = xn @ p["wv"] + p["bv"]
    qh = q.reshape(B, S, NHEAD, HEAD_DIM).transpose(0, 2, 1, 3)
    kh = k.reshape(B, S, NHEAD, HEAD_DIM).transpose(0, 2, 1, 3)
    vh = v.reshape(B, S, NHEAD, HEAD_DIM).transpose(0, 2, 1, 3)
    scores = (qh @ kh.transpose(0, 1, 3, 2)) / math.sqrt(HEAD_DIM)
    attn = jax.nn.softmax(scores, axis=-1) @ vh          # (B,H,S,dh)
    attn = attn.transpose(0, 2, 1, 3).reshape(B, S, D)
    attn = attn @ p["wo"] + p["bo"]
    x1 = x + attn
    x2n = ln(x1, p["ln2_g"], p["ln2_b"])
    ff = jnp.maximum(x2n @ p["w1"] + p["b1"], 0.0) @ p["w2"] + p["b2"]
    return x1 + ff


def encoder_ref(x, all_params):
    for p in all_params:
        x = layer_ref(x, p)
    return x


if __name__ == "__main__":
    B, S, D = 2, 8, D_MODEL          # batch=2, set size=8, d_model=32, nhead=4
    key = jax.random.PRNGKey(0)
    kx, kc, kp = jax.random.split(key, 3)

    x = jax.random.normal(kx, (B, S, D), dtype=jnp.float32)
    x_coords = jax.random.normal(kc, (B, S, 2), dtype=jnp.float32)  # unused, as in PyTorch

    layer_keys = jax.random.split(kp, NUM_LAYERS)
    all_params = [init_layer_params(k, D) for k in layer_keys]

    out = jax.block_until_ready(sets_transformer_encoder(x, x_coords, all_params))

    ref = jax.block_until_ready(encoder_ref(x, all_params))
    np.testing.assert_allclose(np.asarray(out), np.asarray(ref),
                               rtol=5e-4, atol=5e-4)

    print("KERNEL_OK")
</pallas_src>

<mosaic_0001>
module attributes {stable_mosaic.version = 11 : i64} {
  func.func @encoder_kernel(%arg0: memref<2x8x32xf32, #tpu.memory_space<vmem>>, %arg1: memref<1x32xf32, #tpu.memory_space<vmem>>, %arg2: memref<1x32xf32, #tpu.memory_space<vmem>>, %arg3: memref<32x96xf32, #tpu.memory_space<vmem>>, %arg4: memref<1x96xf32, #tpu.memory_space<vmem>>, %arg5: memref<32x32xf32, #tpu.memory_space<vmem>>, %arg6: memref<1x32xf32, #tpu.memory_space<vmem>>, %arg7: memref<1x32xf32, #tpu.memory_space<vmem>>, %arg8: memref<1x32xf32, #tpu.memory_space<vmem>>, %arg9: memref<32x32xf32, #tpu.memory_space<vmem>>, %arg10: memref<1x32xf32, #tpu.memory_space<vmem>>, %arg11: memref<32x32xf32, #tpu.memory_space<vmem>>, %arg12: memref<1x32xf32, #tpu.memory_space<vmem>>, %arg13: memref<1x32xf32, #tpu.memory_space<vmem>>, %arg14: memref<1x32xf32, #tpu.memory_space<vmem>>, %arg15: memref<32x96xf32, #tpu.memory_space<vmem>>, %arg16: memref<1x96xf32, #tpu.memory_space<vmem>>, %arg17: memref<32x32xf32, #tpu.memory_space<vmem>>, %arg18: memref<1x32xf32, #tpu.memory_space<vmem>>, %arg19: memref<1x32xf32, #tpu.memory_space<vmem>>, %arg20: memref<1x32xf32, #tpu.memory_space<vmem>>, %arg21: memref<32x32xf32, #tpu.memory_space<vmem>>, %arg22: memref<1x32xf32, #tpu.memory_space<vmem>>, %arg23: memref<32x32xf32, #tpu.memory_space<vmem>>, %arg24: memref<1x32xf32, #tpu.memory_space<vmem>>, %arg25: memref<2x8x32xf32, #tpu.memory_space<vmem>>) attributes {dimension_semantics = [], scalar_prefetch = 0 : i64, scratch_operands = 0 : i64, tpu.core_type = #tpu.core_type<tc>} {
    %c0 = arith.constant 0 : index
    %c0_0 = arith.constant 0 : index
    %c0_1 = arith.constant 0 : index
    %0 = vector.load %arg0[%c0, %c0_0, %c0_1] : memref<2x8x32xf32, #tpu.memory_space<vmem>>, vector<2x8x32xf32>
    %1 = vector.shape_cast %0 : vector<2x8x32xf32> to vector<16x32xf32>
    %c0_2 = arith.constant 0 : index
    %c0_3 = arith.constant 0 : index
    %2 = vector.load %arg1[%c0_2, %c0_3] : memref<1x32xf32, #tpu.memory_space<vmem>>, vector<1x32xf32>
    %c0_4 = arith.constant 0 : index
    %c0_5 = arith.constant 0 : index
    %3 = vector.load %arg2[%c0_4, %c0_5] : memref<1x32xf32, #tpu.memory_space<vmem>>, vector<1x32xf32>
    %c0_6 = arith.constant 0 : index
    %c0_7 = arith.constant 0 : index
    %4 = vector.load %arg3[%c0_6, %c0_7] : memref<32x96xf32, #tpu.memory_space<vmem>>, vector<32x96xf32>
    %c0_8 = arith.constant 0 : index
    %c0_9 = arith.constant 0 : index
    %5 = vector.load %arg4[%c0_8, %c0_9] : memref<1x96xf32, #tpu.memory_space<vmem>>, vector<1x96xf32>
    %c0_10 = arith.constant 0 : index
    %c0_11 = arith.constant 0 : index
    %6 = vector.load %arg5[%c0_10, %c0_11] : memref<32x32xf32, #tpu.memory_space<vmem>>, vector<32x32xf32>
    %c0_12 = arith.constant 0 : index
    %c0_13 = arith.constant 0 : index
    %7 = vector.load %arg6[%c0_12, %c0_13] : memref<1x32xf32, #tpu.memory_space<vmem>>, vector<1x32xf32>
    %c0_14 = arith.constant 0 : index
    %c0_15 = arith.constant 0 : index
    %8 = vector.load %arg7[%c0_14, %c0_15] : memref<1x32xf32, #tpu.memory_space<vmem>>, vector<1x32xf32>
    %c0_16 = arith.constant 0 : index
    %c0_17 = arith.constant 0 : index
    %9 = vector.load %arg8[%c0_16, %c0_17] : memref<1x32xf32, #tpu.memory_space<vmem>>, vector<1x32xf32>
    %c0_18 = arith.constant 0 : index
    %c0_19 = arith.constant 0 : index
    %10 = vector.load %arg9[%c0_18, %c0_19] : memref<32x32xf32, #tpu.memory_space<vmem>>, vector<32x32xf32>
    %c0_20 = arith.constant 0 : index
    %c0_21 = arith.constant 0 : index
    %11 = vector.load %arg10[%c0_20, %c0_21] : memref<1x32xf32, #tpu.memory_space<vmem>>, vector<1x32xf32>
    %c0_22 = arith.constant 0 : index
    %c0_23 = arith.constant 0 : index
    %12 = vector.load %arg11[%c0_22, %c0_23] : memref<32x32xf32, #tpu.memory_space<vmem>>, vector<32x32xf32>
    %c0_24 = arith.constant 0 : index
    %c0_25 = arith.constant 0 : index
    %13 = vector.load %arg12[%c0_24, %c0_25] : memref<1x32xf32, #tpu.memory_space<vmem>>, vector<1x32xf32>
    %cst = arith.constant dense<0.000000e+00> : vector<16xf32>
    %14 = vector.multi_reduction <add>, %1, %cst [1] : vector<16x32xf32> to vector<16xf32>
    %15 = vector.shape_cast %14 : vector<16xf32> to vector<16x1xf32>
    %cst_26 = arith.constant 3.200000e+01 : f32
    %16 = vector.broadcast %cst_26 : f32 to vector<16x1xf32>
    %17 = arith.divf %15, %16 : vector<16x1xf32>
    %18 = vector.broadcast %17 : vector<16x1xf32> to vector<16x32xf32>
    %19 = arith.subf %1, %18 : vector<16x32xf32>
    %20 = arith.mulf %19, %19 : vector<16x32xf32>
    %cst_27 = arith.constant dense<0.000000e+00> : vector<16xf32>
    %21 = vector.multi_reduction <add>, %20, %cst_27 [1] : vector<16x32xf32> to vector<16xf32>
    %22 = vector.shape_cast %21 : vector<16xf32> to vector<16x1xf32>
    %cst_28 = arith.constant 3.200000e+01 : f32
    %23 = vector.broadcast %cst_28 : f32 to vector<16x1xf32>
    %24 = arith.divf %22, %23 : vector<16x1xf32>
    %cst_29 = arith.constant 9.99999974E-6 : f32
    %25 = vector.broadcast %cst_29 : f32 to vector<16x1xf32>
    %26 = arith.addf %24, %25 : vector<16x1xf32>
    %27 = math.rsqrt %26 : vector<16x1xf32>
    %28 = vector.broadcast %27 : vector<16x1xf32> to vector<16x32xf32>
    %29 = arith.mulf %19, %28 : vector<16x32xf32>
    %30 = vector.broadcast %2 : vector<1x32xf32> to vector<16x32xf32>
    %31 = arith.mulf %29, %30 : vector<16x32xf32>
    %32 = vector.broadcast %3 : vector<1x32xf32> to vector<16x32xf32>
    %33 = arith.addf %31, %32 : vector<16x32xf32>
    %cst_30 = arith.constant dense<0.000000e+00> : vector<16x96xf32>
    %34 = tpu.matmul %33, %4, %cst_30 {dimension_numbers = #tpu.dot_dimension_numbers<[1], [0], [0], [1], [0, 0, 1, 1], [], []>} : vector<16x32xf32>, vector<32x96xf32>, vector<16x96xf32> -> vector<16x96xf32>
    %35 = vector.broadcast %5 : vector<1x96xf32> to vector<16x96xf32>
    %36 = arith.addf %34, %35 : vector<16x96xf32>
    %37 = vector.extract_strided_slice %36 {offsets = [0, 0], sizes = [16, 8], strides = [1, 1]} : vector<16x96xf32> to vector<16x8xf32>
    %38 = vector.shape_cast %37 : vector<16x8xf32> to vector<2x8x8xf32>
    %39 = vector.extract_strided_slice %36 {offsets = [0, 8], sizes = [16, 8], strides = [1, 1]} : vector<16x96xf32> to vector<16x8xf32>
    %40 = vector.shape_cast %39 : vector<16x8xf32> to vector<2x8x8xf32>
    %41 = vector.extract_strided_slice %36 {offsets = [0, 16], sizes = [16, 8], strides = [1, 1]} : vector<16x96xf32> to vector<16x8xf32>
    %42 = vector.shape_cast %41 : vector<16x8xf32> to vector<2x8x8xf32>
    %43 = vector.extract_strided_slice %36 {offsets = [0, 24], sizes = [16, 8], strides = [1, 1]} : vector<16x96xf32> to vector<16x8xf32>
    %44 = vector.shape_cast %43 : vector<16x8xf32> to vector<2x8x8xf32>
    %45 = tpu.concatenate %38, %40, %42, %44 in 0 : vector<2x8x8xf32>, vector<2x8x8xf32>, vector<2x8x8xf32>, vector<2x8x8xf32> -> vector<8x8x8xf32>
    %46 = vector.extract_strided_slice %36 {offsets = [0, 32], sizes = [16, 8], strides = [1, 1]} : vector<16x96xf32> to vector<16x8xf32>
    %47 = vector.shape_cast %46 : vector<16x8xf32> to vector<2x8x8xf32>
    %48 = vector.extract_strided_slice %36 {offsets = [0, 40], sizes = [16, 8], strides = [1, 1]} : vector<16x96xf32> to vector<16x8xf32>
    %49 = vector.shape_cast %48 : vector<16x8xf32> to vector<2x8x8xf32>
    %50 = vector.extract_strided_slice %36 {offsets = [0, 48], sizes = [16, 8], strides = [1, 1]} : vector<16x96xf32> to vector<16x8xf32>
    %51 = vector.shape_cast %50 : vector<16x8xf32> to vector<2x8x8xf32>
    %52 = vector.extract_strided_slice %36 {offsets = [0, 56], sizes = [16, 8], strides = [1, 1]} : vector<16x96xf32> to vector<16x8xf32>
    %53 = vector.shape_cast %52 : vector<16x8xf32> to vector<2x8x8xf32>
    %54 = tpu.concatenate %47, %49, %51, %53 in 0 : vector<2x8x8xf32>, vector<2x8x8xf32>, vector<2x8x8xf32>, vector<2x8x8xf32> -> vector<8x8x8xf32>
    %55 = vector.extract_strided_slice %36 {offsets = [0, 64], sizes = [16, 8], strides = [1, 1]} : vector<16x96xf32> to vector<16x8xf32>
    %56 = vector.shape_cast %55 : vector<16x8xf32> to vector<2x8x8xf32>
    %57 = vector.extract_strided_slice %36 {offsets = [0, 72], sizes = [16, 8], strides = [1, 1]} : vector<16x96xf32> to vector<16x8xf32>
    %58 = vector.shape_cast %57 : vector<16x8xf32> to vector<2x8x8xf32>
    %59 = vector.extract_strided_slice %36 {offsets = [0, 80], sizes = [16, 8], strides = [1, 1]} : vector<16x96xf32> to vector<16x8xf32>
    %60 = vector.shape_cast %59 : vector<16x8xf32> to vector<2x8x8xf32>
    %61 = vector.extract_strided_slice %36 {offsets = [0, 88], sizes = [16, 8], strides = [1, 1]} : vector<16x96xf32> to vector<16x8xf32>
    %62 = vector.shape_cast %61 : vector<16x8xf32> to vector<2x8x8xf32>
    %63 = tpu.concatenate %56, %58, %60, %62 in 0 : vector<2x8x8xf32>, vector<2x8x8xf32>, vector<2x8x8xf32>, vector<2x8x8xf32> -> vector<8x8x8xf32>
    "tpu.trace_start"() <{level = 10 : i32, message = "nqd,nkd->nqk"}> : () -> ()
    %cst_31 = arith.constant dense<0.000000e+00> : vector<8x8x8xf32>
    %64 = tpu.matmul %45, %54, %cst_31 {dimension_numbers = #tpu.dot_dimension_numbers<[2], [2], [1], [1], [0, 0, 0, 1, 1, 1], [0], [0]>} : vector<8x8x8xf32>, vector<8x8x8xf32>, vector<8x8x8xf32> -> vector<8x8x8xf32>
    "tpu.trace_stop"() : () -> ()
    %cst_32 = arith.constant dense<0xFF800000> : vector<8x8xf32>
    %65 = vector.multi_reduction <maximumf>, %64, %cst_32 [2] : vector<8x8x8xf32> to vector<8x8xf32>
    %66 = vector.shape_cast %65 : vector<8x8xf32> to vector<8x8x1xf32>
    %67 = vector.broadcast %66 : vector<8x8x1xf32> to vector<8x8x8xf32>
    %68 = arith.subf %64, %67 : vector<8x8x8xf32>
    %69 = math.exp %68 : vector<8x8x8xf32>
    %cst_33 = arith.constant dense<0.000000e+00> : vector<8x8xf32>
    %70 = vector.multi_reduction <add>, %69, %cst_33 [2] : vector<8x8x8xf32> to vector<8x8xf32>
    %71 = vector.shape_cast %70 : vector<8x8xf32> to vector<8x8x1xf32>
    %72 = tpu.reciprocal %71 {approx = true} : vector<8x8x1xf32> -> vector<8x8x1xf32>
    %73 = vector.broadcast %72 : vector<8x8x1xf32> to vector<8x8x8xf32>
    %74 = arith.mulf %69, %73 : vector<8x8x8xf32>
    "tpu.trace_start"() <{level = 10 : i32, message = "nqk,nkd->nqd"}> : () -> ()
    %cst_34 = arith.constant dense<0.000000e+00> : vector<8x8x8xf32>
    %75 = tpu.matmul %74, %63, %cst_34 {dimension_numbers = #tpu.dot_dimension_numbers<[2], [1], [1], [2], [0, 0, 0, 1, 1, 2], [0], [0]>} : vector<8x8x8xf32>, vector<8x8x8xf32>, vector<8x8x8xf32> -> vector<8x8x8xf32>
    "tpu.trace_stop"() : () -> ()
    %76 = vector.extract_strided_slice %75 {offsets = [0, 0, 0], sizes = [2, 8, 8], strides = [1, 1, 1]} : vector<8x8x8xf32> to vector<2x8x8xf32>
    %77 = vector.shape_cast %76 : vector<2x8x8xf32> to vector<16x8xf32>
    %78 = vector.extract_strided_slice %75 {offsets = [2, 0, 0], sizes = [2, 8, 8], strides = [1, 1, 1]} : vector<8x8x8xf32> to vector<2x8x8xf32>
    %79 = vector.shape_cast %78 : vector<2x8x8xf32> to vector<16x8xf32>
    %80 = vector.extract_strided_slice %75 {offsets = [4, 0, 0], sizes = [2, 8, 8], strides = [1, 1, 1]} : vector<8x8x8xf32> to vector<2x8x8xf32>
    %81 = vector.shape_cast %80 : vector<2x8x8xf32> to vector<16x8xf32>
    %82 = vector.extract_strided_slice %75 {offsets = [6, 0, 0], sizes = [2, 8, 8], strides = [1, 1, 1]} : vector<8x8x8xf32> to vector<2x8x8xf32>
    %83 = vector.shape_cast %82 : vector<2x8x8xf32> to vector<16x8xf32>
    %84 = tpu.concatenate %77, %79, %81, %83 in 1 : vector<16x8xf32>, vector<16x8xf32>, vector<16x8xf32>, vector<16x8xf32> -> vector<16x32xf32>
    %cst_35 = arith.constant dense<0.000000e+00> : vector<16x32xf32>
    %85 = tpu.matmul %84, %6, %cst_35 {dimension_numbers = #tpu.dot_dimension_numbers<[1], [0], [0], [1], [0, 0, 1, 1], [], []>} : vector<16x32xf32>, vector<32x32xf32>, vector<16x32xf32> -> vector<16x32xf32>
    %86 = vector.broadcast %7 : vector<1x32xf32> to vector<16x32xf32>
    %87 = arith.addf %85, %86 : vector<16x32xf32>
    %88 = arith.addf %1, %87 : vector<16x32xf32>
    %cst_36 = arith.constant dense<0.000000e+00> : vector<16xf32>
    %89 = vector.multi_reduction <add>, %88, %cst_36 [1] : vector<16x32xf32> to vector<16xf32>
    %90 = vector.shape_cast %89 : vector<16xf32> to vector<16x1xf32>
    %cst_37 = arith.constant 3.200000e+01 : f32
    %91 = vector.broadcast %cst_37 : f32 to vector<16x1xf32>
    %92 = arith.divf %90, %91 : vector<16x1xf32>
    %93 = vector.broadcast %92 : vector<16x1xf32> to vector<16x32xf32>
    %94 = arith.subf %88, %93 : vector<16x32xf32>
    %95 = arith.mulf %94, %94 : vector<16x32xf32>
    %cst_38 = arith.constant dense<0.000000e+00> : vector<16xf32>
    %96 = vector.multi_reduction <add>, %95, %cst_38 [1] : vector<16x32xf32> to vector<16xf32>
    %97 = vector.shape_cast %96 : vector<16xf32> to vector<16x1xf32>
    %cst_39 = arith.constant 3.200000e+01 : f32
    %98 = vector.broadcast %cst_39 : f32 to vector<16x1xf32>
    %99 = arith.divf %97, %98 : vector<16x1xf32>
    %cst_40 = arith.constant 9.99999974E-6 : f32
    %100 = vector.broadcast %cst_40 : f32 to vector<16x1xf32>
    %101 = arith.addf %99, %100 : vector<16x1xf32>
    %102 = math.rsqrt %101 : vector<16x1xf32>
    %103 = vector.broadcast %102 : vector<16x1xf32> to vector<16x32xf32>
    %104 = arith.mulf %94, %103 : vector<16x32xf32>
    %105 = vector.broadcast %8 : vector<1x32xf32> to vector<16x32xf32>
    %106 = arith.mulf %104, %105 : vector<16x32xf32>
    %107 = vector.broadcast %9 : vector<1x32xf32> to vector<16x32xf32>
    %108 = arith.addf %106, %107 : vector<16x32xf32>
    %cst_41 = arith.constant dense<0.000000e+00> : vector<16x32xf32>
    %109 = tpu.matmul %108, %10, %cst_41 {dimension_numbers = #tpu.dot_dimension_numbers<[1], [0], [0], [1], [0, 0, 1, 1], [], []>} : vector<16x32xf32>, vector<32x32xf32>, vector<16x32xf32> -> vector<16x32xf32>
    %110 = vector.broadcast %11 : vector<1x32xf32> to vector<16x32xf32>
    %111 = arith.addf %109, %110 : vector<16x32xf32>
    %cst_42 = arith.constant 0.000000e+00 : f32
    %112 = vector.broadcast %cst_42 : f32 to vector<16x32xf32>
    %113 = arith.maximumf %111, %112 : vector<16x32xf32>
    %cst_43 = arith.constant dense<0.000000e+00> : vector<16x32xf32>
    %114 = tpu.matmul %113, %12, %cst_43 {dimension_numbers = #tpu.dot_dimension_numbers<[1], [0], [0], [1], [0, 0, 1, 1], [], []>} : vector<16x32xf32>, vector<32x32xf32>, vector<16x32xf32> -> vector<16x32xf32>
    %115 = vector.broadcast %13 : vector<1x32xf32> to vector<16x32xf32>
    %116 = arith.addf %114, %115 : vector<16x32xf32>
    %117 = arith.addf %88, %116 : vector<16x32xf32>
    %c0_44 = arith.constant 0 : index
    %c0_45 = arith.constant 0 : index
    %118 = vector.load %arg13[%c0_44, %c0_45] : memref<1x32xf32, #tpu.memory_space<vmem>>, vector<1x32xf32>
    %c0_46 = arith.constant 0 : index
    %c0_47 = arith.constant 0 : index
    %119 = vector.load %arg14[%c0_46, %c0_47] : memref<1x32xf32, #tpu.memory_space<vmem>>, vector<1x32xf32>
    %c0_48 = arith.constant 0 : index
    %c0_49 = arith.constant 0 : index
    %120 = vector.load %arg15[%c0_48, %c0_49] : memref<32x96xf32, #tpu.memory_space<vmem>>, vector<32x96xf32>
    %c0_50 = arith.constant 0 : index
    %c0_51 = arith.constant 0 : index
    %121 = vector.load %arg16[%c0_50, %c0_51] : memref<1x96xf32, #tpu.memory_space<vmem>>, vector<1x96xf32>
    %c0_52 = arith.constant 0 : index
    %c0_53 = arith.constant 0 : index
    %122 = vector.load %arg17[%c0_52, %c0_53] : memref<32x32xf32, #tpu.memory_space<vmem>>, vector<32x32xf32>
    %c0_54 = arith.constant 0 : index
    %c0_55 = arith.constant 0 : index
    %123 = vector.load %arg18[%c0_54, %c0_55] : memref<1x32xf32, #tpu.memory_space<vmem>>, vector<1x32xf32>
    %c0_56 = arith.constant 0 : index
    %c0_57 = arith.constant 0 : index
    %124 = vector.load %arg19[%c0_56, %c0_57] : memref<1x32xf32, #tpu.memory_space<vmem>>, vector<1x32xf32>
    %c0_58 = arith.constant 0 : index
    %c0_59 = arith.constant 0 : index
    %125 = vector.load %arg20[%c0_58, %c0_59] : memref<1x32xf32, #tpu.memory_space<vmem>>, vector<1x32xf32>
    %c0_60 = arith.constant 0 : index
    %c0_61 = arith.constant 0 : index
    %126 = vector.load %arg21[%c0_60, %c0_61] : memref<32x32xf32, #tpu.memory_space<vmem>>, vector<32x32xf32>
    %c0_62 = arith.constant 0 : index
    %c0_63 = arith.constant 0 : index
    %127 = vector.load %arg22[%c0_62, %c0_63] : memref<1x32xf32, #tpu.memory_space<vmem>>, vector<1x32xf32>
    %c0_64 = arith.constant 0 : index
    %c0_65 = arith.constant 0 : index
    %128 = vector.load %arg23[%c0_64, %c0_65] : memref<32x32xf32, #tpu.memory_space<vmem>>, vector<32x32xf32>
    %c0_66 = arith.constant 0 : index
    %c0_67 = arith.constant 0 : index
    %129 = vector.load %arg24[%c0_66, %c0_67] : memref<1x32xf32, #tpu.memory_space<vmem>>, vector<1x32xf32>
    %cst_68 = arith.constant dense<0.000000e+00> : vector<16xf32>
    %130 = vector.multi_reduction <add>, %117, %cst_68 [1] : vector<16x32xf32> to vector<16xf32>
    %131 = vector.shape_cast %130 : vector<16xf32> to vector<16x1xf32>
    %cst_69 = arith.constant 3.200000e+01 : f32
    %132 = vector.broadcast %cst_69 : f32 to vector<16x1xf32>
    %133 = arith.divf %131, %132 : vector<16x1xf32>
    %134 = vector.broadcast %133 : vector<16x1xf32> to vector<16x32xf32>
    %135 = arith.subf %117, %134 : vector<16x32xf32>
    %136 = arith.mulf %135, %135 : vector<16x32xf32>
    %cst_70 = arith.constant dense<0.000000e+00> : vector<16xf32>
    %137 = vector.multi_reduction <add>, %136, %cst_70 [1] : vector<16x32xf32> to vector<16xf32>
    %138 = vector.shape_cast %137 : vector<16xf32> to vector<16x1xf32>
    %cst_71 = arith.constant 3.200000e+01 : f32
    %139 = vector.broadcast %cst_71 : f32 to vector<16x1xf32>
    %140 = arith.divf %138, %139 : vector<16x1xf32>
    %cst_72 = arith.constant 9.99999974E-6 : f32
    %141 = vector.broadcast %cst_72 : f32 to vector<16x1xf32>
    %142 = arith.addf %140, %141 : vector<16x1xf32>
    %143 = math.rsqrt %142 : vector<16x1xf32>
    %144 = vector.broadcast %143 : vector<16x1xf32> to vector<16x32xf32>
    %145 = arith.mulf %135, %144 : vector<16x32xf32>
    %146 = vector.broadcast %118 : vector<1x32xf32> to vector<16x32xf32>
    %147 = arith.mulf %145, %146 : vector<16x32xf32>
    %148 = vector.broadcast %119 : vector<1x32xf32> to vector<16x32xf32>
    %149 = arith.addf %147, %148 : vector<16x32xf32>
    %cst_73 = arith.constant dense<0.000000e+00> : vector<16x96xf32>
    %150 = tpu.matmul %149, %120, %cst_73 {dimension_numbers = #tpu.dot_dimension_numbers<[1], [0], [0], [1], [0, 0, 1, 1], [], []>} : vector<16x32xf32>, vector<32x96xf32>, vector<16x96xf32> -> vector<16x96xf32>
    %151 = vector.broadcast %121 : vector<1x96xf32> to vector<16x96xf32>
    %152 = arith.addf %150, %151 : vector<16x96xf32>
    %153 = vector.extract_strided_slice %152 {offsets = [0, 0], sizes = [16, 8], strides = [1, 1]} : vector<16x96xf32> to vector<16x8xf32>
    %154 = vector.shape_cast %153 : vector<16x8xf32> to vector<2x8x8xf32>
    %155 = vector.extract_strided_slice %152 {offsets = [0, 8], sizes = [16, 8], strides = [1, 1]} : vector<16x96xf32> to vector<16x8xf32>
    %156 = vector.shape_cast %155 : vector<16x8xf32> to vector<2x8x8xf32>
    %157 = vector.extract_strided_slice %152 {offsets = [0, 16], sizes = [16, 8], strides = [1, 1]} : vector<16x96xf32> to vector<16x8xf32>
    %158 = vector.shape_cast %157 : vector<16x8xf32> to vector<2x8x8xf32>
    %159 = vector.extract_strided_slice %152 {offsets = [0, 24], sizes = [16, 8], strides = [1, 1]} : vector<16x96xf32> to vector<16x8xf32>
    %160 = vector.shape_cast %159 : vector<16x8xf32> to vector<2x8x8xf32>
    %161 = tpu.concatenate %154, %156, %158, %160 in 0 : vector<2x8x8xf32>, vector<2x8x8xf32>, vector<2x8x8xf32>, vector<2x8x8xf32> -> vector<8x8x8xf32>
    %162 = vector.extract_strided_slice %152 {offsets = [0, 32], sizes = [16, 8], strides = [1, 1]} : vector<16x96xf32> to vector<16x8xf32>
    %163 = vector.shape_cast %162 : vector<16x8xf32> to vector<2x8x8xf32>
    %164 = vector.extract_strided_slice %152 {offsets = [0, 40], sizes = [16, 8], strides = [1, 1]} : vector<16x96xf32> to vector<16x8xf32>
    %165 = vector.shape_cast %164 : vector<16x8xf32> to vector<2x8x8xf32>
    %166 = vector.extract_strided_slice %152 {offsets = [0, 48], sizes = [16, 8], strides = [1, 1]} : vector<16x96xf32> to vector<16x8xf32>
    %167 = vector.shape_cast %166 : vector<16x8xf32> to vector<2x8x8xf32>
    %168 = vector.extract_strided_slice %152 {offsets = [0, 56], sizes = [16, 8], strides = [1, 1]} : vector<16x96xf32> to vector<16x8xf32>
    %169 = vector.shape_cast %168 : vector<16x8xf32> to vector<2x8x8xf32>
    %170 = tpu.concatenate %163, %165, %167, %169 in 0 : vector<2x8x8xf32>, vector<2x8x8xf32>, vector<2x8x8xf32>, vector<2x8x8xf32> -> vector<8x8x8xf32>
    %171 = vector.extract_strided_slice %152 {offsets = [0, 64], sizes = [16, 8], strides = [1, 1]} : vector<16x96xf32> to vector<16x8xf32>
    %172 = vector.shape_cast %171 : vector<16x8xf32> to vector<2x8x8xf32>
    %173 = vector.extract_strided_slice %152 {offsets = [0, 72], sizes = [16, 8], strides = [1, 1]} : vector<16x96xf32> to vector<16x8xf32>
    %174 = vector.shape_cast %173 : vector<16x8xf32> to vector<2x8x8xf32>
    %175 = vector.extract_strided_slice %152 {offsets = [0, 80], sizes = [16, 8], strides = [1, 1]} : vector<16x96xf32> to vector<16x8xf32>
    %176 = vector.shape_cast %175 : vector<16x8xf32> to vector<2x8x8xf32>
    %177 = vector.extract_strided_slice %152 {offsets = [0, 88], sizes = [16, 8], strides = [1, 1]} : vector<16x96xf32> to vector<16x8xf32>
    %178 = vector.shape_cast %177 : vector<16x8xf32> to vector<2x8x8xf32>
    %179 = tpu.concatenate %172, %174, %176, %178 in 0 : vector<2x8x8xf32>, vector<2x8x8xf32>, vector<2x8x8xf32>, vector<2x8x8xf32> -> vector<8x8x8xf32>
    "tpu.trace_start"() <{level = 10 : i32, message = "nqd,nkd->nqk"}> : () -> ()
    %cst_74 = arith.constant dense<0.000000e+00> : vector<8x8x8xf32>
    %180 = tpu.matmul %161, %170, %cst_74 {dimension_numbers = #tpu.dot_dimension_numbers<[2], [2], [1], [1], [0, 0, 0, 1, 1, 1], [0], [0]>} : vector<8x8x8xf32>, vector<8x8x8xf32>, vector<8x8x8xf32> -> vector<8x8x8xf32>
    "tpu.trace_stop"() : () -> ()
    %cst_75 = arith.constant dense<0xFF800000> : vector<8x8xf32>
    %181 = vector.multi_reduction <maximumf>, %180, %cst_75 [2] : vector<8x8x8xf32> to vector<8x8xf32>
    %182 = vector.shape_cast %181 : vector<8x8xf32> to vector<8x8x1xf32>
    %183 = vector.broadcast %182 : vector<8x8x1xf32> to vector<8x8x8xf32>
    %184 = arith.subf %180, %183 : vector<8x8x8xf32>
    %185 = math.exp %184 : vector<8x8x8xf32>
    %cst_76 = arith.constant dense<0.000000e+00> : vector<8x8xf32>
    %186 = vector.multi_reduction <add>, %185, %cst_76 [2] : vector<8x8x8xf32> to vector<8x8xf32>
    %187 = vector.shape_cast %186 : vector<8x8xf32> to vector<8x8x1xf32>
    %188 = tpu.reciprocal %187 {approx = true} : vector<8x8x1xf32> -> vector<8x8x1xf32>
    %189 = vector.broadcast %188 : vector<8x8x1xf32> to vector<8x8x8xf32>
    %190 = arith.mulf %185, %189 : vector<8x8x8xf32>
    "tpu.trace_start"() <{level = 10 : i32, message = "nqk,nkd->nqd"}> : () -> ()
    %cst_77 = arith.constant dense<0.000000e+00> : vector<8x8x8xf32>
    %191 = tpu.matmul %190, %179, %cst_77 {dimension_numbers = #tpu.dot_dimension_numbers<[2], [1], [1], [2], [0, 0, 0, 1, 1, 2], [0], [0]>} : vector<8x8x8xf32>, vector<8x8x8xf32>, vector<8x8x8xf32> -> vector<8x8x8xf32>
    "tpu.trace_stop"() : () -> ()
    %192 = vector.extract_strided_slice %191 {offsets = [0, 0, 0], sizes = [2, 8, 8], strides = [1, 1, 1]} : vector<8x8x8xf32> to vector<2x8x8xf32>
    %193 = vector.shape_cast %192 : vector<2x8x8xf32> to vector<16x8xf32>
    %194 = vector.extract_strided_slice %191 {offsets = [2, 0, 0], sizes = [2, 8, 8], strides = [1, 1, 1]} : vector<8x8x8xf32> to vector<2x8x8xf32>
    %195 = vector.shape_cast %194 : vector<2x8x8xf32> to vector<16x8xf32>
    %196 = vector.extract_strided_slice %191 {offsets = [4, 0, 0], sizes = [2, 8, 8], strides = [1, 1, 1]} : vector<8x8x8xf32> to vector<2x8x8xf32>
    %197 = vector.shape_cast %196 : vector<2x8x8xf32> to vector<16x8xf32>
    %198 = vector.extract_strided_slice %191 {offsets = [6, 0, 0], sizes = [2, 8, 8], strides = [1, 1, 1]} : vector<8x8x8xf32> to vector<2x8x8xf32>
    %199 = vector.shape_cast %198 : vector<2x8x8xf32> to vector<16x8xf32>
    %200 = tpu.concatenate %193, %195, %197, %199 in 1 : vector<16x8xf32>, vector<16x8xf32>, vector<16x8xf32>, vector<16x8xf32> -> vector<16x32xf32>
    %cst_78 = arith.constant dense<0.000000e+00> : vector<16x32xf32>
    %201 = tpu.matmul %200, %122, %cst_78 {dimension_numbers = #tpu.dot_dimension_numbers<[1], [0], [0], [1], [0, 0, 1, 1], [], []>} : vector<16x32xf32>, vector<32x32xf32>, vector<16x32xf32> -> vector<16x32xf32>
    %202 = vector.broadcast %123 : vector<1x32xf32> to vector<16x32xf32>
    %203 = arith.addf %201, %202 : vector<16x32xf32>
    %204 = arith.addf %117, %203 : vector<16x32xf32>
    %cst_79 = arith.constant dense<0.000000e+00> : vector<16xf32>
    %205 = vector.multi_reduction <add>, %204, %cst_79 [1] : vector<16x32xf32> to vector<16xf32>
    %206 = vector.shape_cast %205 : vector<16xf32> to vector<16x1xf32>
    %cst_80 = arith.constant 3.200000e+01 : f32
    %207 = vector.broadcast %cst_80 : f32 to vector<16x1xf32>
    %208 = arith.divf %206, %207 : vector<16x1xf32>
    %209 = vector.broadcast %208 : vector<16x1xf32> to vector<16x32xf32>
    %210 = arith.subf %204, %209 : vector<16x32xf32>
    %211 = arith.mulf %210, %210 : vector<16x32xf32>
    %cst_81 = arith.constant dense<0.000000e+00> : vector<16xf32>
    %212 = vector.multi_reduction <add>, %211, %cst_81 [1] : vector<16x32xf32> to vector<16xf32>
    %213 = vector.shape_cast %212 : vector<16xf32> to vector<16x1xf32>
    %cst_82 = arith.constant 3.200000e+01 : f32
    %214 = vector.broadcast %cst_82 : f32 to vector<16x1xf32>
    %215 = arith.divf %213, %214 : vector<16x1xf32>
    %cst_83 = arith.constant 9.99999974E-6 : f32
    %216 = vector.broadcast %cst_83 : f32 to vector<16x1xf32>
    %217 = arith.addf %215, %216 : vector<16x1xf32>
    %218 = math.rsqrt %217 : vector<16x1xf32>
    %219 = vector.broadcast %218 : vector<16x1xf32> to vector<16x32xf32>
    %220 = arith.mulf %210, %219 : vector<16x32xf32>
    %221 = vector.broadcast %124 : vector<1x32xf32> to vector<16x32xf32>
    %222 = arith.mulf %220, %221 : vector<16x32xf32>
    %223 = vector.broadcast %125 : vector<1x32xf32> to vector<16x32xf32>
    %224 = arith.addf %222, %223 : vector<16x32xf32>
    %cst_84 = arith.constant dense<0.000000e+00> : vector<16x32xf32>
    %225 = tpu.matmul %224, %126, %cst_84 {dimension_numbers = #tpu.dot_dimension_numbers<[1], [0], [0], [1], [0, 0, 1, 1], [], []>} : vector<16x32xf32>, vector<32x32xf32>, vector<16x32xf32> -> vector<16x32xf32>
    %226 = vector.broadcast %127 : vector<1x32xf32> to vector<16x32xf32>
    %227 = arith.addf %225, %226 : vector<16x32xf32>
    %cst_85 = arith.constant 0.000000e+00 : f32
    %228 = vector.broadcast %cst_85 : f32 to vector<16x32xf32>
    %229 = arith.maximumf %227, %228 : vector<16x32xf32>
    %cst_86 = arith.constant dense<0.000000e+00> : vector<16x32xf32>
    %230 = tpu.matmul %229, %128, %cst_86 {dimension_numbers = #tpu.dot_dimension_numbers<[1], [0], [0], [1], [0, 0, 1, 1], [], []>} : vector<16x32xf32>, vector<32x32xf32>, vector<16x32xf32> -> vector<16x32xf32>
    %231 = vector.broadcast %129 : vector<1x32xf32> to vector<16x32xf32>
    %232 = arith.addf %230, %231 : vector<16x32xf32>
    %233 = arith.addf %204, %232 : vector<16x32xf32>
    %234 = vector.shape_cast %233 : vector<16x32xf32> to vector<2x8x32xf32>
    %c0_87 = arith.constant 0 : index
    %c0_88 = arith.constant 0 : index
    %c0_89 = arith.constant 0 : index
    %235 = vector.load %arg25[%c0_87, %c0_88, %c0_89] : memref<2x8x32xf32, #tpu.memory_space<vmem>>, vector<2x8x32xf32>
    tpu.vector_store %arg25[%c0_87, %c0_88, %c0_89], %234 {strides = array<i32>} : memref<2x8x32xf32, #tpu.memory_space<vmem>>, vector<2x8x32xf32>,
    return
  }
}

</mosaic_0001>

<bundles_post_ra>
// kernel: sets_transformer_encoder.1
= control target key start
LH: loop header
LB: loop body
LE: loop exit
PB: predicated region body
PF: predicated region fallthrough
CT: control target
= control target key end

     0   :  { %s5093_s0 = inlined_call_operand.vmem [shape: f32[2,8,32], index: 0, kind: input, shape index: {}]   ;;  %s5094_s1 = inlined_call_operand.vmem [shape: f32[1,32], index: 1, kind: input, shape index: {}]   ;;  %s5095_s2 = inlined_call_operand.vmem [shape: f32[1,32], index: 2, kind: input, shape index: {}]   ;;  %s5096_s3 = inlined_call_operand.vmem [shape: f32[32,96], index: 3, kind: input, shape index: {}]   ;;  %s5097_s4 = inlined_call_operand.vmem [shape: f32[1,96], index: 4, kind: input, shape index: {}]   ;;  %s5098_s5 = inlined_call_operand.vmem [shape: f32[32,32], index: 5, kind: input, shape index: {}]   ;;  %s5099_s6 = inlined_call_operand.vmem [shape: f32[1,32], index: 6, kind: input, shape index: {}]   ;;  %s5100_s7 = inlined_call_operand.vmem [shape: f32[1,32], index: 7, kind: input, shape index: {}]   ;;  %s5101_s8 = inlined_call_operand.vmem [shape: f32[1,32], index: 8, kind: input, shape index: {}]   ;;  %s5102_s9 = inlined_call_operand.vmem [shape: f32[32,32], index: 9, kind: input, shape index: {}]   ;;  %s5103_s10 = inlined_call_operand.vmem [shape: f32[1,32], index: 10, kind: input, shape index: {}]   ;;  %s5104_s11 = inlined_call_operand.vmem [shape: f32[32,32], index: 11, kind: input, shape index: {}]   ;;  %s5105_s12 = inlined_call_operand.vmem [shape: f32[1,32], index: 12, kind: input, shape index: {}]   ;;  %s5106_s13 = inlined_call_operand.vmem [shape: f32[1,32], index: 13, kind: input, shape index: {}]   ;;  %s5107_s14 = inlined_call_operand.vmem [shape: f32[1,32], index: 14, kind: input, shape index: {}]   ;;  %s5108_s15 = inlined_call_operand.vmem [shape: f32[32,96], index: 15, kind: input, shape index: {}]   ;;  %s5109_s16 = inlined_call_operand.vmem [shape: f32[1,96], index: 16, kind: input, shape index: {}]   ;;  %s5110_s17 = inlined_call_operand.vmem [shape: f32[32,32], index: 17, kind: input, shape index: {}]   ;;  %s5111_s18 = inlined_call_operand.vmem [shape: f32[1,32], index: 18, kind: input, shape index: {}]   ;;  %s5112_s19 = inlined_call_operand.vmem [shape: f32[1,32], index: 19, kind: input, shape index: {}]   ;;  %s5113_s20 = inlined_call_operand.vmem [shape: f32[1,32], index: 20, kind: input, shape index: {}]   ;;  %s5114_s21 = inlined_call_operand.vmem [shape: f32[32,32], index: 21, kind: input, shape index: {}]   ;;  %s5115_s22 = inlined_call_operand.vmem [shape: f32[1,32], index: 22, kind: input, shape index: {}]   ;;  %s5116_s23 = inlined_call_operand.vmem [shape: f32[32,32], index: 23, kind: input, shape index: {}]   ;;  %s5117_s24 = inlined_call_operand.vmem [shape: f32[1,32], index: 24, kind: input, shape index: {}]   ;;  %s5118_s25 = inlined_call_operand.hbm [shape: f32[2,8,32], index: 25, kind: output, shape index: {}]  }
   0x1   :  { %5127 = sst [smem:[#allocation5_spill]] %s5093_s0 }
   0x2   :  { %5128 = sst [smem:[#allocation6_spill]] %s5094_s1 }
   0x3   :  { %5129 = sst [smem:[#allocation7_spill]] %s5095_s2 }
   0x4   :  { %5130 = sst [smem:[#allocation8_spill]] %s5096_s3 }
   0x5   :  { %5131 = sst [smem:[#allocation9_spill]] %s5097_s4 }
   0x6   :  { %5132 = sst [smem:[#allocation10_spill]] %s5098_s5 }
   0x7   :  { %5133 = sst [smem:[#allocation11_spill]] %s5099_s6 }
   0x8   :  { %5134 = sst [smem:[#allocation12_spill]] %s5100_s7 }
   0x9   :  { %5135 = sst [smem:[#allocation13_spill]] %s5101_s8 }
   0xa   :  { %5136 = sst [smem:[#allocation14_spill]] %s5102_s9 }
   0xb   :  { %s5137_s6 = sld [smem:[#allocation5_spill]]  ;;  %vm107_vm0 = vcmask 261120  }
  0x11   :  { %v4491_v0 = vld [vmem:[%s5137_s6] sm:$0xff]  ;;  %v4496_v1 = vld [vmem:[%s5137_s6 + $0x8] sm:$0xff] }
  0x12   :  { %30 = vsyncpa [#allocation3], 0  ;;  %v108_v2 = vsel %vm107_vm0, %v4491_v0, 0.0  ;;  %v111_v3 = vsel %vm107_vm0, %v4496_v1, 0.0  ;;  %s5138_s1 = sld [smem:[#allocation8_spill]]  ;;  %s5139_s2 = sld [smem:[#allocation6_spill]] }
  0x13   :  { %109 = vadd.xlane.f32.xlu0 %v108_v2  ;;  %s5140_s7 = sld [smem:[#allocation7_spill]]  ;;  %v4346_v37 = vmov 0.0   ;;  %vm4347_vm1 = vmmov 0   ;;  %s4348_s8 = smov 120   ;;  %vm254_vm2 = vcmask 64512   ;;  %vm1583_vm3 = vcmask 130048  }
  0x14   :  { %3929 = vmatprep.subr.mxu1 %v4346_v37  ;;  %3931 = vmatprep.mubr.msk.f32.mxu1 %vm4347_vm1, %v4346_v37  ;;  %s4349_s27 = smov 112   ;;  %s4350_s4 = smov 104   ;;  %vm1586_vm4 = vcmask 195584  }
  0x15   :  { %s4351_s28 = smov 96   ;;  %s4352_s9 = smov 64  }
  0x16   :  { %s5142_s29 = sld [smem:[#allocation10_spill]]  ;;  %s5125_s5 = smov 16  }
  0x17   :  { %112 = vadd.xlane.f32.xlu0 %v111_v3  ;;  %s5123_s0 = smov 24   ;;  %s5143_s6 = sld [smem:[#allocation11_spill]] }
  0x18   :  { %v85_v14 = vld [vmem:[%s5138_s1] sm:$0xff]  ;;  %v86_v15 = vld [vmem:[%s5138_s1 + $0x8] sm:$0xff]  ;;  %v87_v16 = vld [vmem:[%s5138_s1 + $0x10] sm:$0xff]  ;;  %s5144_s3 = sld [smem:[#allocation14_spill]]  ;;  %s5146_s30 = sld [smem:[#allocation13_spill]] }
  0x19   :  { %v4166_v17 = vpack.c.bf16 %v86_v15, %v85_v14  ;;  %v88_v18 = vld [vmem:[%s5138_s1 + $0x18] sm:$0xff]  ;;  %v3726_v27 = vld [vmem:[%s5139_s2] ss:$0 sm:$0xff]  ;;  %s5141_s1 = sld [smem:[#allocation9_spill]] }
  0x1a   :  { %v4170_v19 = vpack.c.bf16 %v88_v18, %v87_v16  ;;  %v3727_v29 = vld [vmem:[%s5140_s7] ss:$0 sm:$0xff] }
  0x1b   :  { %4167 = vmatprep.subr.bf16.mxu0 %v4166_v17 }
  0x1c   :  { %4169 = vmatpush3.bf16.msra.mxu0 %v4166_v17 }
  0x1d   :  { %4171 = vmatprep.subr.bf16.mxu0 %v4170_v19 }
  0x1f   :  { %v3728_v36 = vld [vmem:[%s5141_s1] ss:$0 sm:$0xff]  ;;  %s4353_s1 = smov 8  }
  0x20   :  { %4173 = vmatpush3.bf16.msra.mxu0 %v4170_v19 }
  0x21   :  { %3949 = vmatprep.subr.mxu0 %v4346_v37 }
  0xa0   :  { %v110_v4 = vpop.xlane.xlu0 %109 }
  0xa1   :  { %v115_v5 = vmul.f32 0.03125, %v110_v4 }
  0xa3   :  { %v117_v6 = vsub.f32 %v4491_v0, %v115_v5 }
  0xa4   :  { %v113_v7 = vpop.xlane.xlu0 %112 }
  0xa5   :  { %v116_v8 = vmul.f32 0.03125, %v113_v7  ;;  %v119_v9 = vmul.f32 %v117_v6, %v117_v6 }
  0xa7   :  { %v118_v10 = vsub.f32 %v4496_v1, %v116_v8  ;;  %v121_v11 = vsel %vm107_vm0, %v119_v9, 0.0 }
  0xa8   :  { %122 = vadd.xlane.f32.xlu1 %v121_v11 }
  0xa9   :  { %v120_v12 = vmul.f32 %v118_v10, %v118_v10 }
  0xab   :  { %v124_v13 = vsel %vm107_vm0, %v120_v12, 0.0 }
  0xac   :  { %125 = vadd.xlane.f32.xlu1 %v124_v13 }
 0x135   :  { %v123_v20 = vpop.xlane.xlu1 %122 }
 0x136   :  { %v127_v21 = vmul.f32 0.03125, %v123_v20 }
 0x138   :  { %v129_v22 = vadd.f32 1e-05, %v127_v21 }
 0x139   :  { %v126_v23 = vpop.xlane.xlu1 %125 }
 0x13a   :  { %4242 = vrsqrt.f32 %v129_v22  ;;  %v128_v24 = vmul.f32 0.03125, %v126_v23 }
 0x13c   :  { %v130_v25 = vadd.f32 1e-05, %v128_v24 }
 0x13e   :  { %4244 = vrsqrt.f32 %v130_v25 }
 0x144   :  { %v4243_v26 = vpop.eup %4242 }
 0x145   :  { %v133_v28 = vmul.f32 %v4243_v26, %v117_v6 }
 0x147   :  { %v141_v30 = vmul.f32 %v3726_v27, %v133_v28 }
 0x148   :  { %v4245_v31 = vpop.eup %4244 }
 0x149   :  { %v134_v32 = vmul.f32 %v4245_v31, %v118_v10  ;;  %v149_v33 = vadd.f32 %v3727_v29, %v141_v30 }
 0x14b   :  { %v142_v34 = vmul.f32 %v3726_v27, %v134_v32  ;;  %3926 = vmatprep.mubr.msk.f32.mxu0 %vm107_vm0, %v149_v33 }
 0x14d   :  { %v150_v35 = vadd.f32 %v3727_v29, %v142_v34 }
 0x14f   :  { %3927 = vmatmul.mubr.msk.f32.vlgmr.msra.gmra.mrb[0].mxu0 %vm107_vm0, %v150_v35 }
 0x150   :  { %3951 = vmatprep.mubr.msk.f32.mxu0 %vm4347_vm1, %v4346_v37 }
 0x222   :  { %v3928_v38 = vpop.f32.mrb[0].mxu0 }
 0x223   :  { %v4535_v39 = vadd.f32 %v3928_v38, %v3728_v36  ;;  %v229_v40 = vpop.f32.mrb[1].mxu0 }
 0x224   :  { %v4537_v41 = vadd.f32 %v3728_v36, %v229_v40 }
 0x225   :  { %242 = vrot.lane.b32.xlu1 %v4535_v39, %s4348_s8 }
 0x226   :  { %240 = vrot.lane.b32.xlu0 %v4537_v41, %s4348_s8 }
 0x229   :  { %244 = vrot.lane.b32.xlu1 %v4537_v41, %s4349_s27 }
 0x22a   :  { %248 = vrot.lane.b32.xlu0 %v4537_v41, %s4350_s4 }
 0x22d   :  { %246 = vrot.lane.b32.xlu1 %v4535_v39, %s4349_s27 }
 0x22e   :  { %252 = vrot.lane.b32.xlu0 %v4537_v41, %s4351_s28 }
 0x231   :  { %250 = vrot.lane.b32.xlu1 %v4535_v39, %s4350_s4 }
 0x235   :  { %329 = vrot.lane.b32.xlu1 %v4535_v39, %s4351_s28 }
 0x297   :  { %v4555_v42 = vpop.permute.xlu1 %242 }
 0x298   :  { %481 = vrot.lane.b32.xlu1 %v4555_v42, %s4351_s28  ;;  %v4559_v43 = vpop.permute.xlu0 %240 }
 0x299   :  { %405 = vrot.lane.b32.xlu0 %v4559_v43, %s4351_s28 }
 0x29b   :  { %v4563_v44 = vpop.permute.xlu1 %244 }
 0x29c   :  { %v4565_v45 = vpop.permute.xlu0 %248 }
 0x29d   :  { %557 = vrot.lane.b32.xlu0 %v4563_v44, %s4351_s28 }
 0x29f   :  { %v4569_v46 = vpop.permute.xlu1 %246 }
 0x2a0   :  { %633 = vrot.lane.b32.xlu1 %v4569_v46, %s4351_s28  ;;  %v253_v47 = vpop.permute.xlu0 %252 }
 0x2a1   :  { %709 = vrot.lane.b32.xlu0 %v4565_v45, %s4351_s28  ;;  %3930 = vmatpush3.xpose.msk.msra.mxu1 %vm254_vm2, %v253_v47 }
 0x2a2   :  { %3934 = vmatprep.subr.mxu1 %v4346_v37 }
 0x2a3   :  { %v4577_v48 = vpop.permute.xlu1 %250 }
 0x2a4   :  { %785 = vrot.lane.b32.xlu1 %v4577_v48, %s4351_s28  ;;  %3932 = vmatmul.mubr.msk.f32.vlgmr.msra.gmra.mrb[0].mxu1 %vm254_vm2, %v4537_v41 }
 0x2a5   :  { %3936 = vmatprep.mubr.msk.f32.mxu1 %vm4347_vm1, %v4346_v37 }
 0x2a7   :  { %v330_v49 = vpop.permute.xlu1 %329 }
 0x2a8   :  { %3935 = vmatpush3.xpose.msk.msra.mxu1 %vm254_vm2, %v330_v49 }
 0x2a9   :  { %3939 = vmatprep.subr.mxu1 %v4346_v37 }
 0x2ab   :  { %3937 = vmatmul.mubr.msk.f32.vlgmr.msra.gmra.mrb[2].mxu1 %vm254_vm2, %v4535_v39 }
 0x2ac   :  { %3941 = vmatprep.mubr.msk.f32.mxu1 %vm4347_vm1, %v4346_v37 }
 0x30a   :  { %v482_v51 = vpop.permute.xlu1 %481 }
 0x30b   :  { %v406_v50 = vpop.permute.xlu0 %405 }
 0x30c   :  { %3940 = vmatpush3.xpose.msk.msra.mxu1 %vm254_vm2, %v406_v50 }
 0x30d   :  { %3944 = vmatprep.subr.mxu1 %v4346_v37 }
 0x30f   :  { %3942 = vmatmul.mubr.msk.f32.vlgmr.msra.gmra.mrb[4].mxu1 %vm254_vm2, %v4559_v43  ;;  %v558_v52 = vpop.permute.xlu0 %557 }
 0x310   :  { %3945 = vmatpush3.xpose.msk.msra.mxu1 %vm254_vm2, %v482_v51  ;;  %3950 = vmatpush3.xpose.msk.msra.mxu0 %vm254_vm2, %v558_v52 }
 0x311   :  { %3946 = vmatprep.mubr.msk.f32.mxu1 %vm4347_vm1, %v4346_v37  ;;  %3954 = vmatprep.subr.mxu1 %v4346_v37 }
 0x312   :  { %v634_v53 = vpop.permute.xlu1 %633  ;;  %3959 = vmatprep.subr.mxu0 %v4346_v37 }
 0x313   :  { %3947 = vmatmul.mubr.msk.f32.vlgmr.msra.gmra.mrb[6].mxu1 %vm254_vm2, %v4555_v42  ;;  %3952 = vmatmul.mubr.msk.f32.vlgmr.msra.gmra.mrb[2].mxu0 %vm254_vm2, %v4563_v44  ;;  %v710_v54 = vpop.permute.xlu0 %709 }
 0x314   :  { %3955 = vmatpush3.xpose.msk.msra.mxu1 %vm254_vm2, %v634_v53  ;;  %3960 = vmatpush3.xpose.msk.msra.mxu0 %vm254_vm2, %v710_v54 }
 0x315   :  { %3956 = vmatprep.mubr.msk.f32.mxu1 %vm4347_vm1, %v4346_v37  ;;  %3961 = vmatprep.mubr.msk.f32.mxu0 %vm4347_vm1, %v4346_v37 }
 0x316   :  { %v786_v55 = vpop.permute.xlu1 %785  ;;  %3964 = vmatprep.subr.mxu1 %v4346_v37  ;;  %3969 = vmatprep.subr.mxu0 %v4346_v37 }
 0x317   :  { %3957 = vmatmul.mubr.msk.f32.vlgmr.msra.gmra.mrb[8].mxu1 %vm254_vm2, %v4569_v46  ;;  %3962 = vmatmul.mubr.msk.f32.vlgmr.msra.gmra.mrb[4].mxu0 %vm254_vm2, %v4565_v45 }
 0x318   :  { %3965 = vmatpush3.xpose.msk.msra.mxu1 %vm254_vm2, %v786_v55  ;;  %3966 = vmatprep.mubr.msk.f32.mxu1 %vm4347_vm1, %v4346_v37 }
 0x319   :  { %3974 = vmatprep.subr.mxu1 %v4346_v37  ;;  %3971 = vmatprep.mubr.msk.f32.mxu0 %vm4347_vm1, %v4346_v37 }
 0x31b   :  { %3967 = vmatmul.mubr.msk.f32.vlgmr.msra.gmra.mrb[10].mxu1 %vm254_vm2, %v4577_v48 }
 0x31c   :  { %3976 = vmatprep.mubr.msk.f32.mxu1 %vm4347_vm1, %v4346_v37 }
 0x377   :  { %v325_v56 = vpop.f32.mrb[0].mxu1 }
 0x378   :  { %v3933_v57 = vpop.f32.mrb[1].mxu1  ;;  %v861_v58 = vsel %vm254_vm2, %v325_v56, -inf }
 0x379   :  { %862 = vmax.xlane.f32.xlu0 %v861_v58 }
 0x37e   :  { %v401_v59 = vpop.f32.mrb[2].mxu1 }
 0x37f   :  { %v3938_v60 = vpop.f32.mrb[3].mxu1  ;;  %v864_v61 = vsel %vm254_vm2, %v401_v59, -inf }
 0x380   :  { %865 = vmax.xlane.f32.xlu1 %v864_v61 }
 0x3e2   :  { %v477_v62 = vpop.f32.mrb[4].mxu1 }
 0x3e3   :  { %v3943_v63 = vpop.f32.mrb[5].mxu1  ;;  %v867_v2 = vsel %vm254_vm2, %v477_v62, -inf }
 0x3e4   :  { %868 = vmax.xlane.f32.xlu0 %v867_v2 }
 0x3e6   :  { %v553_v3 = vpop.f32.mrb[6].mxu1  ;;  %v629_v4 = vpop.f32.mrb[2].mxu0 }
 0x3e7   :  { %v3948_v5 = vpop.f32.mrb[7].mxu1  ;;  %v3953_v6 = vpop.f32.mrb[3].mxu0  ;;  %v870_v7 = vsel %vm254_vm2, %v553_v3, -inf  ;;  %v873_v13 = vsel %vm254_vm2, %v629_v4, -inf }
 0x3e8   :  { %871 = vmax.xlane.f32.xlu0 %v870_v7 }
 0x3ea   :  { %v705_v8 = vpop.f32.mrb[8].mxu1  ;;  %v781_v9 = vpop.f32.mrb[4].mxu0 }
 0x3eb   :  { %v3958_v10 = vpop.f32.mrb[9].mxu1  ;;  %v3963_v11 = vpop.f32.mrb[5].mxu0  ;;  %v876_v12 = vsel %vm254_vm2, %v705_v8, -inf  ;;  %v879_v17 = vsel %vm254_vm2, %v781_v9, -inf }
 0x3ec   :  { %877 = vmax.xlane.f32.xlu1 %v876_v12  ;;  %874 = vmax.xlane.f32.xlu0 %v873_v13 }
 0x3ee   :  { %v857_v14 = vpop.f32.mrb[10].mxu1 }
 0x3ef   :  { %v3968_v15 = vpop.f32.mrb[11].mxu1  ;;  %v882_v16 = vsel %vm254_vm2, %v857_v14, -inf }
 0x3f0   :  { %883 = vmax.xlane.f32.xlu1 %v882_v16  ;;  %880 = vmax.xlane.f32.xlu0 %v879_v17 }
 0x401   :  { %1025 = vrot.lane.b32.xlu1 %v4535_v39, %s4352_s9 }
 0x405   :  { %1101 = vrot.lane.b32.xlu1 %v4559_v43, %s4352_s9 }
 0x406   :  { %949 = vrot.lane.b32.xlu0 %v4537_v41, %s4352_s9  ;;  %v863_v18 = vpop.xlane.xlu0 %862 }
 0x407   :  { %v885_v19 = vsub.f32 %v325_v56, %v863_v18 }
 0x409   :  { %1177 = vrot.lane.b32.xlu1 %v4555_v42, %s4352_s9  ;;  %v893_v20 = vmul.f32 1.442695, %v885_v19 }
 0x40a   :  { %1253 = vrot.lane.b32.xlu0 %v4563_v44, %s4352_s9 }
 0x40b   :  { %4246 = vpow2.f32 %v893_v20 }
 0x40d   :  { %1329 = vrot.lane.b32.xlu1 %v4569_v46, %s4352_s9  ;;  %v866_v21 = vpop.xlane.xlu1 %865 }
 0x40e   :  { %v886_v22 = vsub.f32 %v401_v59, %v866_v21 }
 0x410   :  { %v895_v23 = vmul.f32 1.442695, %v886_v22 }
 0x412   :  { %4248 = vpow2.f32 %v895_v23 }
 0x415   :  { %v4647_v24 = vpop.eup %4246 }
 0x416   :  { %v909_v25 = vsel %vm254_vm2, %v4647_v24, 0.0 }
 0x41c   :  { %v4651_v26 = vpop.eup %4248 }
 0x41d   :  { %v912_v27 = vsel %vm254_vm2, %v4651_v26, 0.0 }
 0x429   :  { %910 = vadd.xlane.f32.xlu0 %v909_v25 }
 0x431   :  { %913 = vadd.xlane.f32.xlu1 %v912_v27 }
 0x471   :  { %v869_v28 = vpop.xlane.xlu0 %868 }
 0x472   :  { %v887_v29 = vsub.f32 %v477_v62, %v869_v28 }
 0x474   :  { %v897_v30 = vmul.f32 1.442695, %v887_v29 }
 0x475   :  { %v872_v31 = vpop.xlane.xlu0 %871 }
 0x476   :  { %4250 = vpow2.f32 %v897_v30  ;;  %v888_v32 = vsub.f32 %v553_v3, %v872_v31 }
 0x478   :  { %v899_v33 = vmul.f32 1.442695, %v888_v32 }
 0x479   :  { %v878_v34 = vpop.xlane.xlu1 %877  ;;  %v875_v35 = vpop.xlane.xlu0 %874 }
 0x47a   :  { %4252 = vpow2.f32 %v899_v33  ;;  %v890_v36 = vsub.f32 %v705_v8, %v878_v34  ;;  %v889_v38 = vsub.f32 %v629_v4, %v875_v35  ;;  %v90_v33 = vld [vmem:[%s5142_s29] sm:$0xff]  ;;  %v91_v34 = vld [vmem:[%s5142_s29 + $0x8] sm:$0xff] }
 0x47b   :  { %v4174_v35 = vpack.c.bf16 %v91_v34, %v90_v33 }
 0x47c   :  { %v903_v39 = vmul.f32 1.442695, %v890_v36  ;;  %v901_v40 = vmul.f32 1.442695, %v889_v38  ;;  %v92_v36 = vld [vmem:[%s5142_s29 + $0x10] sm:$0xff]  ;;  %v93_v38 = vld [vmem:[%s5142_s29 + $0x18] sm:$0xff] }
 0x47d   :  { %v884_v41 = vpop.xlane.xlu1 %883  ;;  %v881_v42 = vpop.xlane.xlu0 %880 }
 0x47e   :  { %4254 = vpow2.f32 %v903_v39  ;;  %v892_v43 = vsub.f32 %v857_v14, %v884_v41  ;;  %v891_v44 = vsub.f32 %v781_v9, %v881_v42  ;;  %v4178_v39 = vpack.c.bf16 %v93_v38, %v92_v36  ;;  %v3759_v38 = vld [vmem:[%s5146_s30] ss:$0 sm:$0xff] }
 0x47f   :  { %4256 = vpow2.f32 %v901_v40 }
 0x480   :  { %v4251_v46 = vpop.eup %4250  ;;  %v907_v47 = vmul.f32 1.442695, %v892_v43  ;;  %v905_v49 = vmul.f32 1.442695, %v891_v44 }
 0x481   :  { %v1026_v50 = vpop.permute.xlu1 %1025  ;;  %v950_v51 = vpop.permute.xlu0 %949  ;;  %v915_v52 = vsel %vm254_vm2, %v4251_v46, 0.0 }
 0x482   :  { %4258 = vpow2.f32 %v907_v47  ;;  %3975 = vmatpush3.msra.mxu1 %v1026_v50  ;;  %916 = vadd.xlane.f32.xlu0 %v915_v52 }
 0x483   :  { %4260 = vpow2.f32 %v905_v49  ;;  %3970 = vmatpush3.msra.mxu0 %v950_v51  ;;  %3984 = vmatprep.subr.mxu1 %v4346_v37 }
 0x484   :  { %v4253_v53 = vpop.eup %4252  ;;  %3979 = vmatprep.subr.mxu0 %v4346_v37 }
 0x485   :  { %v918_v54 = vsel %vm254_vm2, %v4253_v53, 0.0  ;;  %v1102_v63 = vpop.permute.xlu1 %1101  ;;  %v1254_v2 = vpop.permute.xlu0 %1253 }
 0x486   :  { %919 = vadd.xlane.f32.xlu1 %v918_v54 }
 0x488   :  { %v4255_v55 = vpop.eup %4254 }
 0x489   :  { %v4257_v56 = vpop.eup %4256  ;;  %v924_v57 = vsel %vm254_vm2, %v4255_v55, 0.0  ;;  %v1178_v3 = vpop.permute.xlu1 %1177 }
 0x48a   :  { %925 = vadd.xlane.f32.xlu1 %v924_v57  ;;  %v921_v58 = vsel %vm254_vm2, %v4257_v56, 0.0 }
 0x48b   :  { %922 = vadd.xlane.f32.xlu0 %v921_v58 }
 0x48c   :  { %v4661_v59 = vpop.eup %4258 }
 0x48d   :  { %v4663_v60 = vpop.eup %4260  ;;  %v930_v61 = vsel %vm254_vm2, %v4661_v59, 0.0  ;;  %v1330_v5 = vpop.permute.xlu1 %1329 }
 0x48e   :  { %931 = vadd.xlane.f32.xlu1 %v930_v61  ;;  %v927_v62 = vsel %vm254_vm2, %v4663_v60, 0.0 }
 0x48f   :  { %928 = vadd.xlane.f32.xlu0 %v927_v62 }
 0x49f   :  { %1481 = vrot.lane.b32.xlu1 %v4577_v48, %s4352_s9 }
 0x4a5   :  { %1405 = vrot.lane.b32.xlu0 %v4565_v45, %s4352_s9 }
 0x4b6   :  { %v911_v4 = vpop.xlane.xlu0 %910 }
 0x4b7   :  { %4262 = vrcp.f32 %v911_v4  ;;  %v3755_v4 = vld [vmem:[%s5143_s6] ss:$0 sm:$0xff] }
 0x4be   :  { %v914_v6 = vpop.xlane.xlu1 %913 }
 0x4bf   :  { %4264 = vrcp.f32 %v914_v6 }
 0x4c1   :  { %v4263_v7 = vpop.eup %4262 }
 0x4c2   :  { %v941_v8 = vmul.f32 %v4263_v7, %v4647_v24 }
 0x4c4   :  { %3972 = vmatmul.mubr.msk.f32.vlgmr.msra.gmra.mrb[6].mxu0 %vm254_vm2, %v941_v8 }
 0x4c5   :  { %3980 = vmatpush3.msra.mxu0 %v1102_v63  ;;  %3981 = vmatprep.mubr.msk.f32.mxu0 %vm4347_vm1, %v4346_v37 }
 0x4c6   :  { %3989 = vmatprep.subr.mxu0 %v4346_v37 }
 0x4c9   :  { %v4265_v45 = vpop.eup %4264 }
 0x4ca   :  { %v942_v48 = vmul.f32 %v4265_v45, %v4651_v26 }
 0x4cc   :  { %3977 = vmatmul.mubr.msk.f32.vlgmr.msra.gmra.mrb[12].mxu1 %vm254_vm2, %v942_v48 }
 0x4cd   :  { %3985 = vmatpush3.msra.mxu1 %v1178_v3  ;;  %3986 = vmatprep.mubr.msk.f32.mxu1 %vm4347_vm1, %v4346_v37 }
 0x4ce   :  { %3994 = vmatprep.subr.mxu1 %v4346_v37 }
 0x50f   :  { %v917_v9 = vpop.xlane.xlu0 %916 }
 0x510   :  { %4266 = vrcp.f32 %v917_v9 }
 0x513   :  { %v920_v10 = vpop.xlane.xlu1 %919 }
 0x514   :  { %4268 = vrcp.f32 %v920_v10 }
 0x517   :  { %v926_v11 = vpop.xlane.xlu1 %925 }
 0x518   :  { %4270 = vrcp.f32 %v926_v11  ;;  %v923_v12 = vpop.xlane.xlu0 %922 }
 0x519   :  { %4272 = vrcp.f32 %v923_v12 }
 0x51a   :  { %v4267_v13 = vpop.eup %4266 }
 0x51b   :  { %v943_v14 = vmul.f32 %v4267_v13, %v4251_v46  ;;  %v932_v15 = vpop.xlane.xlu1 %931 }
 0x51c   :  { %4274 = vrcp.f32 %v932_v15  ;;  %v929_v16 = vpop.xlane.xlu0 %928 }
 0x51d   :  { %4276 = vrcp.f32 %v929_v16  ;;  %3982 = vmatmul.mubr.msk.f32.vlgmr.msra.gmra.mrb[8].mxu0 %vm254_vm2, %v943_v14 }
 0x51e   :  { %v4269_v17 = vpop.eup %4268  ;;  %3990 = vmatpush3.msra.mxu0 %v1254_v2  ;;  %3991 = vmatprep.mubr.msk.f32.mxu0 %vm4347_vm1, %v4346_v37 }
 0x51f   :  { %v944_v18 = vmul.f32 %v4269_v17, %v4253_v53  ;;  %3999 = vmatprep.subr.mxu0 %v4346_v37  ;;  %v1482_v23 = vpop.permute.xlu1 %1481 }
 0x520   :  { %v1406_v25 = vpop.permute.xlu0 %1405 }
 0x521   :  { %3987 = vmatmul.mubr.msk.f32.vlgmr.msra.gmra.mrb[14].mxu1 %vm254_vm2, %v944_v18 }
 0x522   :  { %v4271_v19 = vpop.eup %4270  ;;  %3995 = vmatpush3.msra.mxu1 %v1330_v5  ;;  %3996 = vmatprep.mubr.msk.f32.mxu1 %vm4347_vm1, %v4346_v37 }
 0x523   :  { %v4273_v20 = vpop.eup %4272  ;;  %v946_v21 = vmul.f32 %v4271_v19, %v4255_v55  ;;  %4004 = vmatprep.subr.mxu1 %v4346_v37  ;;  %v97_v19 = vld [vmem:[%s5144_s3] sm:$0xff] }
 0x524   :  { %v945_v22 = vmul.f32 %v4273_v20, %v4257_v56  ;;  %v98_v20 = vld [vmem:[%s5144_s3 + $0x8] sm:$0xff] }
 0x525   :  { %3997 = vmatmul.mubr.msk.f32.vlgmr.msra.gmra.mrb[16].mxu1 %vm254_vm2, %v946_v21  ;;  %v4182_v21 = vpack.c.bf16 %v98_v20, %v97_v19 }
 0x526   :  { %v4275_v24 = vpop.eup %4274  ;;  %3992 = vmatmul.mubr.msk.f32.vlgmr.msra.gmra.mrb[10].mxu0 %vm254_vm2, %v945_v22  ;;  %4005 = vmatpush3.msra.mxu1 %v1482_v23  ;;  %v99_v22 = vld [vmem:[%s5144_s3 + $0x10] sm:$0xff]  ;;  %v100_v23 = vld [vmem:[%s5144_s3 + $0x18] sm:$0xff]  ;;  %s5145_s3 = sld [smem:[#allocation12_spill]] }
 0x527   :  { %v4277_v26 = vpop.eup %4276  ;;  %v948_v27 = vmul.f32 %v4275_v24, %v4661_v59  ;;  %4000 = vmatpush3.msra.mxu0 %v1406_v25  ;;  %4001 = vmatprep.mubr.msk.f32.mxu0 %vm4347_vm1, %v4346_v37  ;;  %v4186_v24 = vpack.c.bf16 %v100_v23, %v99_v22  ;;  %v102_v25 = vld [vmem:[%s5104_s11] sm:$0xff] }
 0x528   :  { %v947_v28 = vmul.f32 %v4277_v26, %v4663_v60  ;;  %4006 = vmatprep.mubr.msk.f32.mxu1 %vm4347_vm1, %v4346_v37  ;;  %4175 = vmatprep.subr.bf16.mxu0 %v4174_v35  ;;  %v103_v26 = vld [vmem:[%s5104_s11 + $0x8] sm:$0xff]  ;;  %v3766_v23 = vld [vmem:[%s5106_s13] ss:$0 sm:$0xff] }
 0x529   :  { %4007 = vmatmul.mubr.msk.f32.vlgmr.msra.gmra.mrb[18].mxu1 %vm254_vm2, %v948_v27  ;;  %4183 = vmatprep.subr.bf16.mxu1 %v4182_v21  ;;  %v4190_v27 = vpack.c.bf16 %v103_v26, %v102_v25 }
 0x52a   :  { %4002 = vmatmul.mubr.msk.f32.vlgmr.msra.gmra.mrb[12].mxu0 %vm254_vm2, %v947_v28  ;;  %4185 = vmatpush3.bf16.msra.mxu1 %v4182_v21 }
 0x52b   :  { %4177 = vmatpush3.bf16.msra.mxu0 %v4174_v35  ;;  %4187 = vmatprep.subr.bf16.mxu1 %v4186_v24 }
 0x52c   :  { %4179 = vmatprep.subr.bf16.mxu0 %v4178_v39  ;;  %v3758_v35 = vld [vmem:[%s5145_s3] ss:$0 sm:$0xff] }
 0x52e   :  { %4189 = vmatpush3.bf16.msra.mxu1 %v4186_v24 }
 0x52f   :  { %4181 = vmatpush3.bf16.msra.mxu0 %v4178_v39 }
 0x530   :  { %4191 = vmatprep.subr.bf16.mxu0 %v4190_v27 }
 0x597   :  { %v1021_v29 = vpop.f32.mrb[6].mxu0 }
 0x598   :  { %v3973_v30 = vpop.f32.mrb[7].mxu0 }
 0x59f   :  { %v1097_v31 = vpop.f32.mrb[12].mxu1 }
 0x5a0   :  { %v3978_v32 = vpop.f32.mrb[13].mxu1 }
 0x5f0   :  { %v1173_v40 = vpop.f32.mrb[8].mxu0 }
 0x5f1   :  { %1559 = vrot.lane.b32.xlu0 %v1173_v40, %s4353_s1  ;;  %v3983_v41 = vpop.f32.mrb[9].mxu0 }
 0x5f4   :  { %v1249_v42 = vpop.f32.mrb[14].mxu1 }
 0x5f5   :  { %1561 = vrot.lane.b32.xlu1 %v1249_v42, %s4353_s1  ;;  %v3988_v43 = vpop.f32.mrb[15].mxu1 }
 0x5f8   :  { %v1401_v44 = vpop.f32.mrb[16].mxu1 }
 0x5f9   :  { %v1325_v46 = vpop.f32.mrb[10].mxu0  ;;  %1569 = vrot.lane.b32.xlu1 %v1401_v44, %s5125_s5  ;;  %v3998_v47 = vpop.f32.mrb[17].mxu1 }
 0x5fa   :  { %1567 = vrot.lane.b32.xlu0 %v1325_v46, %s5125_s5  ;;  %v3993_v49 = vpop.f32.mrb[11].mxu0  ;;  %v104_v46 = vld [vmem:[%s5104_s11 + $0x10] sm:$0xff]  ;;  %v105_v47 = vld [vmem:[%s5104_s11 + $0x18] sm:$0xff] }
 0x5fb   :  { %v4194_v49 = vpack.c.bf16 %v105_v47, %v104_v46 }
 0x5fc   :  { %v1553_v50 = vpop.f32.mrb[18].mxu1 }
 0x5fd   :  { %v1477_v51 = vpop.f32.mrb[12].mxu0  ;;  %1577 = vrot.lane.b32.xlu1 %v1553_v50, %s5123_s0  ;;  %v4008_v52 = vpop.f32.mrb[19].mxu1  ;;  %v3760_v50 = vld [vmem:[%s5103_s10] ss:$0 sm:$0xff] }
 0x5fe   :  { %1575 = vrot.lane.b32.xlu0 %v1477_v51, %s5123_s0  ;;  %v4003_v53 = vpop.f32.mrb[13].mxu0 }
 0x663   :  { %v1560_v55 = vpop.permute.xlu0 %1559 }
 0x664   :  { %v1581_v59 = vsel %vm254_vm2, %v1021_v29, %v1560_v55 }
 0x667   :  { %v1562_v54 = vpop.permute.xlu1 %1561 }
 0x668   :  { %v1582_v58 = vsel %vm254_vm2, %v1097_v31, %v1562_v54 }
 0x66b   :  { %v1570_v56 = vpop.permute.xlu1 %1569 }
 0x66c   :  { %v1568_v57 = vpop.permute.xlu0 %1567  ;;  %v1585_v60 = vsel %vm1583_vm3, %v1582_v58, %v1570_v56 }
 0x66d   :  { %v1584_v62 = vsel %vm1583_vm3, %v1581_v59, %v1568_v57  ;;  %v3763_v57 = vld [vmem:[%s5105_s12] ss:$0 sm:$0xff]  ;;  %s5147_s12 = smov 16  }
 0x66f   :  { %v1578_v61 = vpop.permute.xlu1 %1577 }
 0x670   :  { %v1588_v63 = vsel %vm1586_vm4, %v1585_v60, %v1578_v61  ;;  %v1576_v2 = vpop.permute.xlu0 %1575 }
 0x671   :  { %v1587_v3 = vsel %vm1586_vm4, %v1584_v62, %v1576_v2 }
 0x672   :  { %4017 = vmatprep.mubr.msk.f32.mxu0 %vm107_vm0, %v1587_v3 }
 0x673   :  { %4018 = vmatmul.mubr.msk.f32.vlgmr.msra.gmra.mrb[14].mxu0 %vm107_vm0, %v1588_v63 }
 0x674   :  { %4193 = vmatpush3.bf16.msra.mxu0 %v4190_v27  ;;  %v3767_v27 = vld [vmem:[%s5107_s14] ss:$0 sm:$0xff] }
 0x675   :  { %4195 = vmatprep.subr.bf16.mxu0 %v4194_v49 }
 0x678   :  { %4197 = vmatpush3.bf16.msra.mxu0 %v4194_v49 }
 0x679   :  { %4053 = vmatprep.subr.mxu0 %v4346_v37 }
 0x746   :  { %v4019_v5 = vpop.f32.mrb[14].mxu0 }
 0x747   :  { %v1673_v6 = vadd.f32 %v4019_v5, %v3755_v4  ;;  %v1667_v7 = vpop.f32.mrb[15].mxu0 }
 0x748   :  { %v1668_v8 = vadd.f32 %v3755_v4, %v1667_v7 }
 0x749   :  { %v4731_v45 = vadd.f32 %v1673_v6, %v4496_v1 }
 0x74a   :  { %v4734_v48 = vadd.f32 %v1668_v8, %v4491_v0 }
 0x74b   :  { %v1681_v9 = vsel %vm107_vm0, %v4731_v45, 0.0 }
 0x74c   :  { %1682 = vadd.xlane.f32.xlu1 %v1681_v9  ;;  %v1678_v10 = vsel %vm107_vm0, %v4734_v48, 0.0 }
 0x74d   :  { %1679 = vadd.xlane.f32.xlu0 %v1678_v10 }
 0x7d9   :  { %v1683_v11 = vpop.xlane.xlu1 %1682 }
 0x7da   :  { %v1685_v12 = vmul.f32 0.03125, %v1683_v11  ;;  %v1680_v13 = vpop.xlane.xlu0 %1679 }
 0x7db   :  { %v1684_v14 = vmul.f32 0.03125, %v1680_v13  ;;  %v1901_v13 = vld [vmem:[%s5108_s15 + $0x8] sm:$0xff] }
 0x7dc   :  { %v1687_v15 = vsub.f32 %v4731_v45, %v1685_v12  ;;  %v1900_v12 = vld [vmem:[%s5108_s15] sm:$0xff] }
 0x7dd   :  { %v1686_v1 = vsub.f32 %v4734_v48, %v1684_v14  ;;  %v4198_v14 = vpack.c.bf16 %v1901_v13, %v1900_v12 }
 0x7de   :  { %v1689_v17 = vmul.f32 %v1687_v15, %v1687_v15 }
 0x7df   :  { %v1688_v16 = vmul.f32 %v1686_v1, %v1686_v1  ;;  %4199 = vmatprep.subr.bf16.mxu1 %v4198_v14 }
 0x7e0   :  { %v1693_v18 = vsel %vm107_vm0, %v1689_v17, 0.0 }
 0x7e1   :  { %v1690_v0 = vsel %vm107_vm0, %v1688_v16, 0.0 }
 0x7e2   :  { %1691 = vadd.xlane.f32.xlu0 %v1690_v0 }
 0x7e6   :  { %1694 = vadd.xlane.f32.xlu0 %v1693_v18 }
 0x86f   :  { %v1692_v28 = vpop.xlane.xlu0 %1691 }
 0x870   :  { %v1696_v29 = vmul.f32 0.03125, %v1692_v28 }
 0x872   :  { %v1698_v30 = vadd.f32 1e-05, %v1696_v29 }
 0x873   :  { %v1695_v31 = vpop.xlane.xlu0 %1694 }
 0x874   :  { %4278 = vrsqrt.f32 %v1698_v30  ;;  %v1697_v32 = vmul.f32 0.03125, %v1695_v31 }
 0x876   :  { %v1699_v33 = vadd.f32 1e-05, %v1697_v32  ;;  %v3768_v32 = vld [vmem:[%s5109_s16] ss:$0 sm:$0xff] }
 0x878   :  { %4280 = vrsqrt.f32 %v1699_v33 }
 0x87e   :  { %v4279_v34 = vpop.eup %4278 }
 0x87f   :  { %v1702_v36 = vmul.f32 %v4279_v34, %v1686_v1  ;;  %v1903_v1 = vld [vmem:[%s5108_s15 + $0x18] sm:$0xff] }
 0x881   :  { %v1710_v39 = vmul.f32 %v3758_v35, %v1702_v36 }
 0x882   :  { %v4281_v40 = vpop.eup %4280 }
 0x883   :  { %v1703_v41 = vmul.f32 %v4281_v40, %v1687_v15  ;;  %v1718_v42 = vadd.f32 %v3759_v38, %v1710_v39  ;;  %v1902_v15 = vld [vmem:[%s5108_s15 + $0x10] sm:$0xff] }
 0x884   :  { %v4202_v16 = vpack.c.bf16 %v1903_v1, %v1902_v15 }
 0x885   :  { %v1711_v43 = vmul.f32 %v3758_v35, %v1703_v41  ;;  %4028 = vmatprep.mubr.msk.f32.mxu1 %vm107_vm0, %v1718_v42 }
 0x887   :  { %v1719_v44 = vadd.f32 %v3759_v38, %v1711_v43 }
 0x889   :  { %4029 = vmatmul.mubr.msk.f32.vlgmr.msra.gmra.mrb[20].mxu1 %vm107_vm0, %v1719_v44 }
 0x88a   :  { %4201 = vmatpush3.bf16.msra.mxu1 %v4198_v14 }
 0x88b   :  { %4203 = vmatprep.subr.bf16.mxu1 %v4202_v16 }
 0x88e   :  { %4205 = vmatpush3.bf16.msra.mxu1 %v4202_v16 }
 0x88f   :  { %4058 = vmatprep.subr.mxu1 %v4346_v37 }
 0x95c   :  { %v4030_v51 = vpop.f32.mrb[20].mxu1 }
 0x95d   :  { %v1804_v52 = vadd.f32 %v4030_v51, %v3760_v50  ;;  %v1798_v53 = vpop.f32.mrb[21].mxu1 }
 0x95e   :  { %v1799_v54 = vadd.f32 %v3760_v50, %v1798_v53 }
 0x95f   :  { %v1808_v56 = vmax.f32 %v1804_v52, 0.0 }
 0x960   :  { %v1807_v55 = vmax.f32 %v1799_v54, 0.0 }
 0x962   :  { %4039 = vmatprep.mubr.msk.f32.mxu0 %vm107_vm0, %v1807_v55 }
 0x963   :  { %4040 = vmatmul.mubr.msk.f32.vlgmr.msra.gmra.mrb[16].mxu0 %vm107_vm0, %v1808_v56 }
 0x964   :  { %4055 = vmatprep.mubr.msk.f32.mxu0 %vm4347_vm1, %v4346_v37 }
 0xa36   :  { %v4041_v58 = vpop.f32.mrb[16].mxu0 }
 0xa37   :  { %v1893_v59 = vadd.f32 %v4041_v58, %v3763_v57  ;;  %v1887_v60 = vpop.f32.mrb[17].mxu0 }
 0xa38   :  { %v1888_v61 = vadd.f32 %v3763_v57, %v1887_v60 }
 0xa39   :  { %v4788_v62 = vadd.f32 %v1893_v59, %v4731_v45 }
 0xa3a   :  { %v4791_v63 = vadd.f32 %v1888_v61, %v4734_v48 }
 0xa3b   :  { %v1925_v2 = vsel %vm107_vm0, %v4788_v62, 0.0 }
 0xa3c   :  { %1926 = vadd.xlane.f32.xlu1 %v1925_v2  ;;  %v1922_v3 = vsel %vm107_vm0, %v4791_v63, 0.0 }
 0xa3d   :  { %1923 = vadd.xlane.f32.xlu0 %v1922_v3 }
 0xac9   :  { %v1927_v4 = vpop.xlane.xlu1 %1926 }
 0xaca   :  { %v1929_v5 = vmul.f32 0.03125, %v1927_v4  ;;  %v1924_v6 = vpop.xlane.xlu0 %1923 }
 0xacb   :  { %v1928_v7 = vmul.f32 0.03125, %v1924_v6 }
 0xacc   :  { %v1931_v8 = vsub.f32 %v4788_v62, %v1929_v5 }
 0xacd   :  { %v1930_v45 = vsub.f32 %v4791_v63, %v1928_v7 }
 0xace   :  { %v1933_v9 = vmul.f32 %v1931_v8, %v1931_v8 }
 0xacf   :  { %v1932_v10 = vmul.f32 %v1930_v45, %v1930_v45 }
 0xad0   :  { %v1937_v48 = vsel %vm107_vm0, %v1933_v9, 0.0 }
 0xad1   :  { %1938 = vadd.xlane.f32.xlu1 %v1937_v48  ;;  %v1934_v11 = vsel %vm107_vm0, %v1932_v10, 0.0 }
 0xad2   :  { %1935 = vadd.xlane.f32.xlu0 %v1934_v11 }
 0xb5e   :  { %v1939_v0 = vpop.xlane.xlu1 %1938 }
 0xb5f   :  { %v1941_v17 = vmul.f32 0.03125, %v1939_v0  ;;  %v1936_v18 = vpop.xlane.xlu0 %1935 }
 0xb60   :  { %v1940_v19 = vmul.f32 0.03125, %v1936_v18 }
 0xb61   :  { %v1943_v20 = vadd.f32 1e-05, %v1941_v17 }
 0xb62   :  { %v1942_v21 = vadd.f32 1e-05, %v1940_v19 }
 0xb63   :  { %4282 = vrsqrt.f32 %v1943_v20 }
 0xb64   :  { %4284 = vrsqrt.f32 %v1942_v21 }
 0xb6d   :  { %v4283_v22 = vpop.eup %4282 }
 0xb6e   :  { %v4285_v24 = vpop.eup %4284  ;;  %v1947_v25 = vmul.f32 %v4283_v22, %v1931_v8 }
 0xb6f   :  { %v1946_v26 = vmul.f32 %v4285_v24, %v1930_v45 }
 0xb70   :  { %v1955_v28 = vmul.f32 %v3766_v23, %v1947_v25 }
 0xb71   :  { %v1954_v29 = vmul.f32 %v3766_v23, %v1946_v26 }
 0xb72   :  { %v1963_v31 = vadd.f32 %v3767_v27, %v1955_v28 }
 0xb73   :  { %v1962_v30 = vadd.f32 %v3767_v27, %v1954_v29 }
 0xb75   :  { %4050 = vmatprep.mubr.msk.f32.mxu1 %vm107_vm0, %v1962_v30 }
 0xb76   :  { %4051 = vmatmul.mubr.msk.f32.vlgmr.msra.gmra.mrb[22].mxu1 %vm107_vm0, %v1963_v31 }
 0xb77   :  { %4060 = vmatprep.mubr.msk.f32.mxu1 %vm4347_vm1, %v4346_v37 }
 0xc49   :  { %v4052_v33 = vpop.f32.mrb[22].mxu1 }
 0xc4a   :  { %v4827_v34 = vadd.f32 %v4052_v33, %v3768_v32  ;;  %v2042_v35 = vpop.f32.mrb[23].mxu1 }
 0xc4b   :  { %v4829_v36 = vadd.f32 %v3768_v32, %v2042_v35 }
 0xc4c   :  { %2055 = vrot.lane.b32.xlu1 %v4827_v34, %s4348_s8 }
 0xc4d   :  { %2053 = vrot.lane.b32.xlu0 %v4829_v36, %s4348_s8 }
 0xc50   :  { %2057 = vrot.lane.b32.xlu1 %v4829_v36, %s4349_s27 }
 0xc51   :  { %2061 = vrot.lane.b32.xlu0 %v4829_v36, %s4350_s4 }
 0xc54   :  { %2059 = vrot.lane.b32.xlu1 %v4827_v34, %s4349_s27 }
 0xc55   :  { %2065 = vrot.lane.b32.xlu0 %v4829_v36, %s4351_s28 }
 0xc58   :  { %2063 = vrot.lane.b32.xlu1 %v4827_v34, %s4350_s4 }
 0xc5c   :  { %2141 = vrot.lane.b32.xlu1 %v4827_v34, %s4351_s28 }
 0xcbe   :  { %v4847_v38 = vpop.permute.xlu1 %2055 }
 0xcbf   :  { %2293 = vrot.lane.b32.xlu1 %v4847_v38, %s4351_s28  ;;  %v4851_v39 = vpop.permute.xlu0 %2053 }
 0xcc0   :  { %2217 = vrot.lane.b32.xlu0 %v4851_v39, %s4351_s28 }
 0xcc2   :  { %v4855_v40 = vpop.permute.xlu1 %2057 }
 0xcc3   :  { %v4857_v41 = vpop.permute.xlu0 %2061 }
 0xcc4   :  { %2369 = vrot.lane.b32.xlu0 %v4855_v40, %s4351_s28 }
 0xcc6   :  { %v4861_v42 = vpop.permute.xlu1 %2059 }
 0xcc7   :  { %2445 = vrot.lane.b32.xlu1 %v4861_v42, %s4351_s28  ;;  %v2066_v43 = vpop.permute.xlu0 %2065 }
 0xcc8   :  { %2521 = vrot.lane.b32.xlu0 %v4857_v41, %s4351_s28  ;;  %4054 = vmatpush3.xpose.msk.msra.mxu0 %vm254_vm2, %v2066_v43 }
 0xcc9   :  { %4063 = vmatprep.subr.mxu0 %v4346_v37 }
 0xcca   :  { %v4869_v44 = vpop.permute.xlu1 %2063 }
 0xccb   :  { %2597 = vrot.lane.b32.xlu1 %v4869_v44, %s4351_s28  ;;  %4056 = vmatmul.mubr.msk.f32.vlgmr.msra.gmra.mrb[18].mxu0 %vm254_vm2, %v4829_v36 }
 0xccc   :  { %4065 = vmatprep.mubr.msk.f32.mxu0 %vm4347_vm1, %v4346_v37 }
 0xcce   :  { %v2142_v46 = vpop.permute.xlu1 %2141 }
 0xccf   :  { %4059 = vmatpush3.xpose.msk.msra.mxu1 %vm254_vm2, %v2142_v46 }
 0xcd0   :  { %4068 = vmatprep.subr.mxu1 %v4346_v37 }
 0xcd2   :  { %4061 = vmatmul.mubr.msk.f32.vlgmr.msra.gmra.mrb[24].mxu1 %vm254_vm2, %v4827_v34 }
 0xcd3   :  { %4070 = vmatprep.mubr.msk.f32.mxu1 %vm4347_vm1, %v4346_v37 }
 0xd31   :  { %v2294_v47 = vpop.permute.xlu1 %2293 }
 0xd32   :  { %4069 = vmatpush3.xpose.msk.msra.mxu1 %vm254_vm2, %v2294_v47  ;;  %v2218_v49 = vpop.permute.xlu0 %2217 }
 0xd33   :  { %4064 = vmatpush3.xpose.msk.msra.mxu0 %vm254_vm2, %v2218_v49  ;;  %4078 = vmatprep.subr.mxu1 %v4346_v37 }
 0xd34   :  { %4073 = vmatprep.subr.mxu0 %v4346_v37 }
 0xd35   :  { %4071 = vmatmul.mubr.msk.f32.vlgmr.msra.gmra.mrb[26].mxu1 %vm254_vm2, %v4847_v38 }
 0xd36   :  { %4066 = vmatmul.mubr.msk.f32.vlgmr.msra.gmra.mrb[20].mxu0 %vm254_vm2, %v4851_v39  ;;  %v2370_v50 = vpop.permute.xlu0 %2369  ;;  %4080 = vmatprep.mubr.msk.f32.mxu1 %vm4347_vm1, %v4346_v37 }
 0xd37   :  { %4074 = vmatpush3.xpose.msk.msra.mxu0 %vm254_vm2, %v2370_v50  ;;  %4075 = vmatprep.mubr.msk.f32.mxu0 %vm4347_vm1, %v4346_v37 }
 0xd38   :  { %4083 = vmatprep.subr.mxu0 %v4346_v37 }
 0xd39   :  { %v2446_v51 = vpop.permute.xlu1 %2445 }
 0xd3a   :  { %4076 = vmatmul.mubr.msk.f32.vlgmr.msra.gmra.mrb[22].mxu0 %vm254_vm2, %v4855_v40  ;;  %4079 = vmatpush3.xpose.msk.msra.mxu1 %vm254_vm2, %v2446_v51  ;;  %v2522_v52 = vpop.permute.xlu0 %2521 }
 0xd3b   :  { %4084 = vmatpush3.xpose.msk.msra.mxu0 %vm254_vm2, %v2522_v52  ;;  %4088 = vmatprep.subr.mxu1 %v4346_v37 }
 0xd3c   :  { %4085 = vmatprep.mubr.msk.f32.mxu0 %vm4347_vm1, %v4346_v37  ;;  %4093 = vmatprep.subr.mxu0 %v4346_v37 }
 0xd3d   :  { %4081 = vmatmul.mubr.msk.f32.vlgmr.msra.gmra.mrb[28].mxu1 %vm254_vm2, %v4861_v42  ;;  %v2598_v53 = vpop.permute.xlu1 %2597 }
 0xd3e   :  { %4086 = vmatmul.mubr.msk.f32.vlgmr.msra.gmra.mrb[24].mxu0 %vm254_vm2, %v4857_v41  ;;  %4089 = vmatpush3.xpose.msk.msra.mxu1 %vm254_vm2, %v2598_v53 }
 0xd3f   :  { %4090 = vmatprep.mubr.msk.f32.mxu1 %vm4347_vm1, %v4346_v37  ;;  %4098 = vmatprep.subr.mxu1 %v4346_v37 }
 0xd40   :  { %4095 = vmatprep.mubr.msk.f32.mxu0 %vm4347_vm1, %v4346_v37 }
 0xd41   :  { %4091 = vmatmul.mubr.msk.f32.vlgmr.msra.gmra.mrb[30].mxu1 %vm254_vm2, %v4869_v44 }
 0xd42   :  { %4100 = vmatprep.mubr.msk.f32.mxu1 %vm4347_vm1, %v4346_v37 }
 0xd9e   :  { %v2137_v54 = vpop.f32.mrb[18].mxu0 }
 0xd9f   :  { %v4057_v55 = vpop.f32.mrb[19].mxu0  ;;  %v2673_v56 = vsel %vm254_vm2, %v2137_v54, -inf }
 0xda0   :  { %2674 = vmax.xlane.f32.xlu0 %v2673_v56 }
 0xda5   :  { %v2213_v57 = vpop.f32.mrb[24].mxu1 }
 0xda6   :  { %v4062_v58 = vpop.f32.mrb[25].mxu1  ;;  %v2676_v59 = vsel %vm254_vm2, %v2213_v57, -inf }
 0xda7   :  { %2677 = vmax.xlane.f32.xlu1 %v2676_v59 }
 0xe08   :  { %v2365_v60 = vpop.f32.mrb[26].mxu1 }
 0xe09   :  { %v2289_v61 = vpop.f32.mrb[20].mxu0  ;;  %v4072_v2 = vpop.f32.mrb[27].mxu1  ;;  %v2682_v3 = vsel %vm254_vm2, %v2365_v60, -inf }
 0xe0a   :  { %2683 = vmax.xlane.f32.xlu0 %v2682_v3  ;;  %v4067_v4 = vpop.f32.mrb[21].mxu0  ;;  %v2679_v6 = vsel %vm254_vm2, %v2289_v61, -inf }
 0xe0d   :  { %v2441_v5 = vpop.f32.mrb[22].mxu0 }
 0xe0e   :  { %2680 = vmax.xlane.f32.xlu0 %v2679_v6  ;;  %v4077_v7 = vpop.f32.mrb[23].mxu0  ;;  %v2685_v48 = vsel %vm254_vm2, %v2441_v5, -inf }
 0xe10   :  { %v2517_v8 = vpop.f32.mrb[28].mxu1 }
 0xe11   :  { %v4082_v45 = vpop.f32.mrb[29].mxu1  ;;  %v2593_v9 = vpop.f32.mrb[24].mxu0  ;;  %v2688_v10 = vsel %vm254_vm2, %v2517_v8, -inf }
 0xe12   :  { %2689 = vmax.xlane.f32.xlu1 %v2688_v10  ;;  %2686 = vmax.xlane.f32.xlu0 %v2685_v48  ;;  %v4087_v11 = vpop.f32.mrb[25].mxu0  ;;  %v2691_v15 = vsel %vm254_vm2, %v2593_v9, -inf }
 0xe14   :  { %v2669_v12 = vpop.f32.mrb[30].mxu1 }
 0xe15   :  { %v4092_v13 = vpop.f32.mrb[31].mxu1  ;;  %v2694_v14 = vsel %vm254_vm2, %v2669_v12, -inf }
 0xe16   :  { %2695 = vmax.xlane.f32.xlu1 %v2694_v14  ;;  %2692 = vmax.xlane.f32.xlu0 %v2691_v15 }
 0xe27   :  { %2837 = vrot.lane.b32.xlu1 %v4827_v34, %s4352_s9 }
 0xe2b   :  { %2913 = vrot.lane.b32.xlu1 %v4851_v39, %s4352_s9 }
 0xe2c   :  { %2761 = vrot.lane.b32.xlu0 %v4829_v36, %s4352_s9 }
 0xe2d   :  { %v2675_v1 = vpop.xlane.xlu0 %2674 }
 0xe2e   :  { %v2697_v16 = vsub.f32 %v2137_v54, %v2675_v1 }
 0xe2f   :  { %2989 = vrot.lane.b32.xlu1 %v4847_v38, %s4352_s9 }
 0xe30   :  { %3065 = vrot.lane.b32.xlu0 %v4855_v40, %s4352_s9  ;;  %v2705_v0 = vmul.f32 1.442695, %v2697_v16 }
 0xe32   :  { %4286 = vpow2.f32 %v2705_v0 }
 0xe33   :  { %3141 = vrot.lane.b32.xlu1 %v4861_v42, %s4352_s9 }
 0xe34   :  { %v2678_v17 = vpop.xlane.xlu1 %2677 }
 0xe35   :  { %v2698_v18 = vsub.f32 %v2213_v57, %v2678_v17 }
 0xe37   :  { %v2707_v19 = vmul.f32 1.442695, %v2698_v18 }
 0xe39   :  { %4288 = vpow2.f32 %v2707_v19 }
 0xe3c   :  { %v4939_v20 = vpop.eup %4286 }
 0xe3d   :  { %v2721_v21 = vsel %vm254_vm2, %v4939_v20, 0.0 }
 0xe43   :  { %v4943_v22 = vpop.eup %4288 }
 0xe44   :  { %v2724_v23 = vsel %vm254_vm2, %v4943_v22, 0.0 }
 0xe4f   :  { %2722 = vadd.xlane.f32.xlu0 %v2721_v21 }
 0xe57   :  { %2725 = vadd.xlane.f32.xlu1 %v2724_v23 }
 0xe97   :  { %v2684_v24 = vpop.xlane.xlu0 %2683 }
 0xe98   :  { %v2700_v25 = vsub.f32 %v2365_v60, %v2684_v24 }
 0xe9a   :  { %v2711_v26 = vmul.f32 1.442695, %v2700_v25 }
 0xe9b   :  { %v2681_v27 = vpop.xlane.xlu0 %2680 }
 0xe9c   :  { %4290 = vpow2.f32 %v2711_v26  ;;  %v2699_v28 = vsub.f32 %v2289_v61, %v2681_v27 }
 0xe9e   :  { %v2709_v29 = vmul.f32 1.442695, %v2699_v28 }
 0xe9f   :  { %v2690_v30 = vpop.xlane.xlu1 %2689  ;;  %v2687_v31 = vpop.xlane.xlu0 %2686 }
 0xea0   :  { %4292 = vpow2.f32 %v2709_v29  ;;  %v2702_v32 = vsub.f32 %v2517_v8, %v2690_v30  ;;  %v2701_v33 = vsub.f32 %v2441_v5, %v2687_v31  ;;  %v1905_v29 = vld [vmem:[%s5110_s17] sm:$0xff]  ;;  %v1906_v30 = vld [vmem:[%s5110_s17 + $0x8] sm:$0xff] }
 0xea1   :  { %v4206_v31 = vpack.c.bf16 %v1906_v30, %v1905_v29  ;;  %v3798_v30 = vld [vmem:[%s5112_s19] ss:$0 sm:$0xff] }
 0xea2   :  { %v2715_v34 = vmul.f32 1.442695, %v2702_v32  ;;  %v2713_v35 = vmul.f32 1.442695, %v2701_v33  ;;  %v1908_v32 = vld [vmem:[%s5110_s17 + $0x18] sm:$0xff] }
 0xea3   :  { %v2696_v36 = vpop.xlane.xlu1 %2695  ;;  %v2693_v38 = vpop.xlane.xlu0 %2692 }
 0xea4   :  { %4294 = vpow2.f32 %v2715_v34  ;;  %v2704_v39 = vsub.f32 %v2669_v12, %v2696_v36  ;;  %v2703_v40 = vsub.f32 %v2593_v9, %v2693_v38 }
 0xea5   :  { %4296 = vpow2.f32 %v2713_v35 }
 0xea6   :  { %v4291_v42 = vpop.eup %4290  ;;  %v2719_v43 = vmul.f32 1.442695, %v2704_v39  ;;  %v2717_v46 = vmul.f32 1.442695, %v2703_v40 }
 0xea7   :  { %v2838_v47 = vpop.permute.xlu1 %2837  ;;  %v2762_v49 = vpop.permute.xlu0 %2761  ;;  %v2730_v50 = vsel %vm254_vm2, %v4291_v42, 0.0 }
 0xea8   :  { %4298 = vpow2.f32 %v2719_v43  ;;  %4099 = vmatpush3.msra.mxu1 %v2838_v47  ;;  %2731 = vadd.xlane.f32.xlu1 %v2730_v50 }
 0xea9   :  { %4300 = vpow2.f32 %v2717_v46  ;;  %4094 = vmatpush3.msra.mxu0 %v2762_v49  ;;  %4108 = vmatprep.subr.mxu1 %v4346_v37 }
 0xeaa   :  { %v4293_v51 = vpop.eup %4292  ;;  %4103 = vmatprep.subr.mxu0 %v4346_v37 }
 0xeab   :  { %v2727_v52 = vsel %vm254_vm2, %v4293_v51, 0.0  ;;  %v2914_v61 = vpop.permute.xlu1 %2913  ;;  %v3066_v2 = vpop.permute.xlu0 %3065 }
 0xeac   :  { %2728 = vadd.xlane.f32.xlu0 %v2727_v52 }
 0xeae   :  { %v4295_v53 = vpop.eup %4294 }
 0xeaf   :  { %v4297_v54 = vpop.eup %4296  ;;  %v2736_v55 = vsel %vm254_vm2, %v4295_v53, 0.0  ;;  %v2990_v3 = vpop.permute.xlu1 %2989 }
 0xeb0   :  { %2737 = vadd.xlane.f32.xlu1 %v2736_v55  ;;  %v2733_v56 = vsel %vm254_vm2, %v4297_v54, 0.0 }
 0xeb1   :  { %2734 = vadd.xlane.f32.xlu0 %v2733_v56 }
 0xeb2   :  { %v4953_v57 = vpop.eup %4298 }
 0xeb3   :  { %v4955_v58 = vpop.eup %4300  ;;  %v2742_v59 = vsel %vm254_vm2, %v4953_v57, 0.0  ;;  %v3142_v5 = vpop.permute.xlu1 %3141 }
 0xeb4   :  { %2743 = vadd.xlane.f32.xlu1 %v2742_v59  ;;  %v2739_v60 = vsel %vm254_vm2, %v4955_v58, 0.0 }
 0xeb5   :  { %2740 = vadd.xlane.f32.xlu0 %v2739_v60 }
 0xec5   :  { %3293 = vrot.lane.b32.xlu1 %v4869_v44, %s4352_s9 }
 0xecb   :  { %3217 = vrot.lane.b32.xlu0 %v4857_v41, %s4352_s9 }
 0xedc   :  { %v2723_v4 = vpop.xlane.xlu0 %2722 }
 0xedd   :  { %4302 = vrcp.f32 %v2723_v4 }
 0xee4   :  { %v2726_v6 = vpop.xlane.xlu1 %2725 }
 0xee5   :  { %4304 = vrcp.f32 %v2726_v6 }
 0xee7   :  { %v4303_v7 = vpop.eup %4302 }
 0xee8   :  { %v2753_v8 = vmul.f32 %v4303_v7, %v4939_v20 }
 0xeea   :  { %4096 = vmatmul.mubr.msk.f32.vlgmr.msra.gmra.mrb[26].mxu0 %vm254_vm2, %v2753_v8 }
 0xeeb   :  { %4104 = vmatpush3.msra.mxu0 %v2914_v61  ;;  %4105 = vmatprep.mubr.msk.f32.mxu0 %vm4347_vm1, %v4346_v37 }
 0xeec   :  { %4113 = vmatprep.subr.mxu0 %v4346_v37 }
 0xeef   :  { %v4305_v41 = vpop.eup %4304 }
 0xef0   :  { %v2754_v44 = vmul.f32 %v4305_v41, %v4943_v22 }
 0xef2   :  { %4101 = vmatmul.mubr.msk.f32.vlgmr.msra.gmra.mrb[32].mxu1 %vm254_vm2, %v2754_v44 }
 0xef3   :  { %4109 = vmatpush3.msra.mxu1 %v2990_v3  ;;  %4110 = vmatprep.mubr.msk.f32.mxu1 %vm4347_vm1, %v4346_v37  ;;  %v3795_v3 = vld [vmem:[%s5111_s18] ss:$0 sm:$0xff] }
 0xef4   :  { %4118 = vmatprep.subr.mxu1 %v4346_v37 }
 0xf35   :  { %v2732_v45 = vpop.xlane.xlu1 %2731 }
 0xf36   :  { %4306 = vrcp.f32 %v2732_v45 }
 0xf39   :  { %v2729_v9 = vpop.xlane.xlu0 %2728 }
 0xf3a   :  { %4308 = vrcp.f32 %v2729_v9 }
 0xf3d   :  { %v2738_v10 = vpop.xlane.xlu1 %2737 }
 0xf3e   :  { %4310 = vrcp.f32 %v2738_v10  ;;  %v2735_v48 = vpop.xlane.xlu0 %2734 }
 0xf3f   :  { %4312 = vrcp.f32 %v2735_v48 }
 0xf40   :  { %v4307_v11 = vpop.eup %4306 }
 0xf41   :  { %v2756_v12 = vmul.f32 %v4307_v11, %v4291_v42  ;;  %v2744_v13 = vpop.xlane.xlu1 %2743 }
 0xf42   :  { %4314 = vrcp.f32 %v2744_v13  ;;  %v2741_v14 = vpop.xlane.xlu0 %2740 }
 0xf43   :  { %4316 = vrcp.f32 %v2741_v14  ;;  %4111 = vmatmul.mubr.msk.f32.vlgmr.msra.gmra.mrb[34].mxu1 %vm254_vm2, %v2756_v12 }
 0xf44   :  { %v4309_v15 = vpop.eup %4308  ;;  %4119 = vmatpush3.msra.mxu1 %v3142_v5  ;;  %4120 = vmatprep.mubr.msk.f32.mxu1 %vm4347_vm1, %v4346_v37 }
 0xf45   :  { %v2755_v1 = vmul.f32 %v4309_v15, %v4293_v51  ;;  %4128 = vmatprep.subr.mxu1 %v4346_v37  ;;  %v3294_v19 = vpop.permute.xlu1 %3293 }
 0xf46   :  { %v3218_v21 = vpop.permute.xlu0 %3217 }
 0xf47   :  { %4106 = vmatmul.mubr.msk.f32.vlgmr.msra.gmra.mrb[28].mxu0 %vm254_vm2, %v2755_v1  ;;  %v1912_v1 = vld [vmem:[%s5114_s21] sm:$0xff] }
 0xf48   :  { %v4311_v16 = vpop.eup %4310  ;;  %4114 = vmatpush3.msra.mxu0 %v3066_v2  ;;  %4115 = vmatprep.mubr.msk.f32.mxu0 %vm4347_vm1, %v4346_v37 }
 0xf49   :  { %v4313_v0 = vpop.eup %4312  ;;  %v2758_v17 = vmul.f32 %v4311_v16, %v4295_v53  ;;  %4123 = vmatprep.subr.mxu0 %v4346_v37  ;;  %v1913_v16 = vld [vmem:[%s5114_s21 + $0x8] sm:$0xff] }
 0xf4a   :  { %v2757_v18 = vmul.f32 %v4313_v0, %v4297_v54  ;;  %v4214_v0 = vpack.c.bf16 %v1913_v16, %v1912_v1 }
 0xf4b   :  { %4121 = vmatmul.mubr.msk.f32.vlgmr.msra.gmra.mrb[36].mxu1 %vm254_vm2, %v2758_v17  ;;  %v1914_v17 = vld [vmem:[%s5114_s21 + $0x10] sm:$0xff] }
 0xf4c   :  { %v4315_v20 = vpop.eup %4314  ;;  %4116 = vmatmul.mubr.msk.f32.vlgmr.msra.gmra.mrb[30].mxu0 %vm254_vm2, %v2757_v18  ;;  %4129 = vmatpush3.msra.mxu1 %v3294_v19  ;;  %v1915_v18 = vld [vmem:[%s5114_s21 + $0x18] sm:$0xff] }
 0xf4d   :  { %v4317_v22 = vpop.eup %4316  ;;  %v2760_v23 = vmul.f32 %v4315_v20, %v4953_v57  ;;  %4124 = vmatpush3.msra.mxu0 %v3218_v21  ;;  %4125 = vmatprep.mubr.msk.f32.mxu0 %vm4347_vm1, %v4346_v37  ;;  %v4218_v19 = vpack.c.bf16 %v1915_v18, %v1914_v17  ;;  %v1917_v20 = vld [vmem:[%s5116_s23] sm:$0xff]  ;;  %v1918_v21 = vld [vmem:[%s5116_s23 + $0x8] sm:$0xff] }
 0xf4e   :  { %v2759_v24 = vmul.f32 %v4317_v22, %v4955_v58  ;;  %4130 = vmatprep.mubr.msk.f32.mxu1 %vm4347_vm1, %v4346_v37  ;;  %4207 = vmatprep.subr.bf16.mxu0 %v4206_v31  ;;  %v1907_v37 = vld [vmem:[%s5110_s17 + $0x10] sm:$0xff]  ;;  %s5148_s17 = smov 24   ;;  %v4222_v22 = vpack.c.bf16 %v1918_v21, %v1917_v20 }
 0xf4f   :  { %4131 = vmatmul.mubr.msk.f32.vlgmr.msra.gmra.mrb[38].mxu1 %vm254_vm2, %v2760_v23  ;;  %v4210_v33 = vpack.c.bf16 %v1908_v32, %v1907_v37  ;;  %4215 = vmatprep.subr.bf16.mxu1 %v4214_v0  ;;  %v3799_v37 = vld [vmem:[%s5113_s20] ss:$0 sm:$0xff] }
 0xf50   :  { %4126 = vmatmul.mubr.msk.f32.vlgmr.msra.gmra.mrb[32].mxu0 %vm254_vm2, %v2759_v24  ;;  %4217 = vmatpush3.bf16.msra.mxu1 %v4214_v0 }
 0xf51   :  { %4209 = vmatpush3.bf16.msra.mxu0 %v4206_v31  ;;  %4219 = vmatprep.subr.bf16.mxu1 %v4218_v19 }
 0xf52   :  { %4211 = vmatprep.subr.bf16.mxu0 %v4210_v33 }
 0xf54   :  { %4221 = vmatpush3.bf16.msra.mxu1 %v4218_v19 }
 0xf55   :  { %4213 = vmatpush3.bf16.msra.mxu0 %v4210_v33 }
 0xf56   :  { %4223 = vmatprep.subr.bf16.mxu0 %v4222_v22 }
 0xfbd   :  { %v2833_v25 = vpop.f32.mrb[26].mxu0 }
 0xfbe   :  { %v4097_v26 = vpop.f32.mrb[27].mxu0 }
 0xfc5   :  { %v2909_v27 = vpop.f32.mrb[32].mxu1 }
 0xfc6   :  { %v4102_v28 = vpop.f32.mrb[33].mxu1 }
0x1016   :  { %v3061_v34 = vpop.f32.mrb[34].mxu1 }
0x1017   :  { %3373 = vrot.lane.b32.xlu1 %v3061_v34, %s4353_s1  ;;  %v4112_v35 = vpop.f32.mrb[35].mxu1 }
0x101a   :  { %v2985_v36 = vpop.f32.mrb[28].mxu0 }
0x101b   :  { %3371 = vrot.lane.b32.xlu0 %v2985_v36, %s4353_s1  ;;  %v4107_v38 = vpop.f32.mrb[29].mxu0 }
0x101e   :  { %v3213_v39 = vpop.f32.mrb[36].mxu1 }
0x101f   :  { %v3137_v40 = vpop.f32.mrb[30].mxu0  ;;  %3381 = vrot.lane.b32.xlu1 %v3213_v39, %s5147_s12  ;;  %v4122_v42 = vpop.f32.mrb[37].mxu1  ;;  %v1919_v39 = vld [vmem:[%s5116_s23 + $0x10] sm:$0xff] }
0x1020   :  { %3379 = vrot.lane.b32.xlu0 %v3137_v40, %s5147_s12  ;;  %v4117_v43 = vpop.f32.mrb[31].mxu0  ;;  %v1920_v40 = vld [vmem:[%s5116_s23 + $0x18] sm:$0xff]  ;;  %s4356_s23 = smov [#allocation2]  }
0x1021   :  { %v4226_v42 = vpack.c.bf16 %v1920_v40, %v1919_v39  ;;  %v3800_v43 = vld [vmem:[%s5115_s22] ss:$0 sm:$0xff]  ;;  %s3715_s6 = sshll.u32 %s4356_s23, 4  ;;  %s3716_s6 = int_to_ptr.vmem [resolvable:$true] %s3715_s6 }
0x1022   :  { %v3365_v46 = vpop.f32.mrb[38].mxu1  ;;  %s4322_s22 = scalar_lea.vmem %s3716_s6, 256  ;;  %p4327_p1 = scmp.lt.s32.totalorder %s3716_s6, %s3716_s6 }
0x1023   :  { %v3289_v47 = vpop.f32.mrb[32].mxu0  ;;  %3389 = vrot.lane.b32.xlu1 %v3365_v46, %s5148_s17  ;;  %v4132_v49 = vpop.f32.mrb[39].mxu1  ;;  %p4323_p0 = scmp.ne.s32.totalorder %s3716_s6, %s4322_s22  ;;  %p4328_p2 = scmp.lt.s32.totalorder %s4322_s22, %s4322_s22 }
0x1024   :  { %3387 = vrot.lane.b32.xlu0 %v3289_v47, %s5148_s17  ;;  %v4127_v50 = vpop.f32.mrb[33].mxu0 }
0x1025   :  { %p4329_p3 = por %p4328_p2, %p4327_p1 }
0x1027   :  { %p4330_p4 = pnand %p4329_p3, %p4323_p0 }
0x1089   :  { %v3374_v51 = vpop.permute.xlu1 %3373 }
0x108a   :  { %v3394_v55 = vsel %vm254_vm2, %v2909_v27, %v3374_v51 }
0x108d   :  { %v3372_v52 = vpop.permute.xlu0 %3371 }
0x108e   :  { %v3393_v56 = vsel %vm254_vm2, %v2833_v25, %v3372_v52 }
0x1091   :  { %v3382_v53 = vpop.permute.xlu1 %3381 }
0x1092   :  { %v3380_v54 = vpop.permute.xlu0 %3379  ;;  %v3396_v57 = vsel %vm1583_vm3, %v3394_v55, %v3382_v53  ;;  %v3803_v53 = vld [vmem:[%s5117_s24] ss:$0 sm:$0xff] }
0x1093   :  { %v3395_v59 = vsel %vm1583_vm3, %v3393_v56, %v3380_v54 }
0x1095   :  { %v3390_v58 = vpop.permute.xlu1 %3389 }
0x1096   :  { %v3398_v60 = vsel %vm1586_vm4, %v3396_v57, %v3390_v58  ;;  %v3388_v61 = vpop.permute.xlu0 %3387 }
0x1097   :  { %v3397_v2 = vsel %vm1586_vm4, %v3395_v59, %v3388_v61 }
0x1098   :  { %4141 = vmatprep.mubr.msk.f32.mxu0 %vm107_vm0, %v3397_v2 }
0x1099   :  { %4142 = vmatmul.mubr.msk.f32.vlgmr.msra.gmra.mrb[34].mxu0 %vm107_vm0, %v3398_v60 }
0x109a   :  { %4225 = vmatpush3.bf16.msra.mxu0 %v4222_v22 }
0x109b   :  { %4227 = vmatprep.subr.bf16.mxu0 %v4226_v42 }
0x109e   :  { %4229 = vmatpush3.bf16.msra.mxu0 %v4226_v42 }
0x116c   :  { %v4143_v4 = vpop.f32.mrb[34].mxu0 }
0x116d   :  { %v3483_v5 = vadd.f32 %v4143_v4, %v3795_v3  ;;  %v3477_v6 = vpop.f32.mrb[35].mxu0 }
0x116e   :  { %v3478_v7 = vadd.f32 %v3795_v3, %v3477_v6 }
0x116f   :  { %v5023_v8 = vadd.f32 %v3483_v5, %v4788_v62 }
0x1170   :  { %v5026_v41 = vadd.f32 %v3478_v7, %v4791_v63 }
0x1171   :  { %v3491_v44 = vsel %vm107_vm0, %v5023_v8, 0.0 }
0x1172   :  { %3492 = vadd.xlane.f32.xlu1 %v3491_v44  ;;  %v3488_v45 = vsel %vm107_vm0, %v5026_v41, 0.0 }
0x1173   :  { %3489 = vadd.xlane.f32.xlu0 %v3488_v45 }
0x11ff   :  { %v3493_v9 = vpop.xlane.xlu1 %3492 }
0x1200   :  { %v3495_v10 = vmul.f32 0.03125, %v3493_v9  ;;  %v3490_v48 = vpop.xlane.xlu0 %3489 }
0x1201   :  { %v3494_v11 = vmul.f32 0.03125, %v3490_v48 }
0x1202   :  { %v3497_v12 = vsub.f32 %v5023_v8, %v3495_v10 }
0x1203   :  { %v3496_v62 = vsub.f32 %v5026_v41, %v3494_v11 }
0x1204   :  { %v3499_v14 = vmul.f32 %v3497_v12, %v3497_v12 }
0x1205   :  { %v3498_v13 = vmul.f32 %v3496_v62, %v3496_v62 }
0x1206   :  { %v3503_v15 = vsel %vm107_vm0, %v3499_v14, 0.0 }
0x1207   :  { %v3500_v63 = vsel %vm107_vm0, %v3498_v13, 0.0 }
0x1208   :  { %3501 = vadd.xlane.f32.xlu0 %v3500_v63 }
0x120c   :  { %3504 = vadd.xlane.f32.xlu0 %v3503_v15 }
0x1295   :  { %v3502_v23 = vpop.xlane.xlu0 %3501 }
0x1296   :  { %v3506_v24 = vmul.f32 0.03125, %v3502_v23 }
0x1298   :  { %v3508_v25 = vadd.f32 1e-05, %v3506_v24 }
0x1299   :  { %v3505_v26 = vpop.xlane.xlu0 %3504 }
0x129a   :  { %4318 = vrsqrt.f32 %v3508_v25  ;;  %v3507_v27 = vmul.f32 0.03125, %v3505_v26 }
0x129c   :  { %v3509_v28 = vadd.f32 1e-05, %v3507_v27 }
0x129e   :  { %4320 = vrsqrt.f32 %v3509_v28 }
0x12a4   :  { %v4319_v29 = vpop.eup %4318 }
0x12a5   :  { %v3512_v31 = vmul.f32 %v4319_v29, %v3496_v62 }
0x12a7   :  { %v3520_v32 = vmul.f32 %v3798_v30, %v3512_v31 }
0x12a8   :  { %v4321_v33 = vpop.eup %4320 }
0x12a9   :  { %v3513_v34 = vmul.f32 %v4321_v33, %v3497_v12  ;;  %v3528_v35 = vadd.f32 %v3799_v37, %v3520_v32 }
0x12ab   :  { %v3521_v36 = vmul.f32 %v3798_v30, %v3513_v34  ;;  %4152 = vmatprep.mubr.msk.f32.mxu1 %vm107_vm0, %v3528_v35 }
0x12ad   :  { %v3529_v38 = vadd.f32 %v3799_v37, %v3521_v36 }
0x12af   :  { %4153 = vmatmul.mubr.msk.f32.vlgmr.msra.gmra.mrb[40].mxu1 %vm107_vm0, %v3529_v38 }
0x1382   :  { %v4154_v46 = vpop.f32.mrb[40].mxu1 }
0x1383   :  { %v3614_v47 = vadd.f32 %v4154_v46, %v3800_v43  ;;  %v3608_v49 = vpop.f32.mrb[41].mxu1 }
0x1384   :  { %v3609_v50 = vadd.f32 %v3800_v43, %v3608_v49 }
0x1385   :  { %v3618_v52 = vmax.f32 %v3614_v47, 0.0 }
0x1386   :  { %v3617_v51 = vmax.f32 %v3609_v50, 0.0 }
0x1388   :  { %4163 = vmatprep.mubr.msk.f32.mxu0 %vm107_vm0, %v3617_v51 }
0x1389   :  { %4164 = vmatmul.mubr.msk.f32.vlgmr.msra.gmra.mrb[36].mxu0 %vm107_vm0, %v3618_v52 }
0x145c   :  { %v4165_v54 = vpop.f32.mrb[36].mxu0 }
0x145d   :  { %v3703_v55 = vadd.f32 %v4165_v54, %v3803_v53  ;;  %v3697_v56 = vpop.f32.mrb[37].mxu0 }
0x145e   :  { %v3698_v57 = vadd.f32 %v3803_v53, %v3697_v56 }
0x145f   :  { %v3707_v58 = vadd.f32 %v3703_v55, %v5023_v8 }
0x1460   :  { %v3706_v59 = vadd.f32 %v3698_v57, %v5026_v41 }
0x1461   :  { %3709 = vst.msk [vmem:[#allocation2 + $0x8] sm:$0xff] %vm107_vm0, %v3707_v58 }
0x1462   :  { %3708 = vst.msk [vmem:[#allocation2] sm:$0xff] %vm107_vm0, %v3706_v59 }
0x1463   :  { %4333 = shalt.err (!%p4330_p4)
}
0x1464   :  { %s4334_s18 = scalar_lea.hbm %s5118_s25, 256 }
0x1465   :  { %p4335_p5 = scmp.ne.s32.totalorder %s5118_s25, %s4334_s18  ;;  %p4338_p6 = scmp.lt.u32.totalorder %s4334_s18, %s5118_s25 }
0x1467   :  { %p4340_p7 = pnand %p4338_p6, %p4335_p5 }
0x1469   :  { %4343 = shalt.err (!%p4340_p7)
}
0x146a   :  { %s4357_s0 = smov 128  }
0x146b   :  { %3721 = dma.vmem_to_hbm [thread:$0]  %s3716_s6, 256, %s5118_s25, [#allocation3], %s4357_s0, %s4357_s0, %s4353_s1  }
0x146c   :  { %4344 = dma.done.wait [#allocation3], 256  }
0x146d   :  { %4345 = vsyncadd [#allocation3], 4294967040 }
0x146e   :  { %3725 = vsyncpa [#allocation3], 1 }

</bundles_post_ra>
